<compile_context>
chip_gen: v7x
topology: tpu7x:2x2x1
jax: 0.10.0
libtpu: 0.0.40
codegen_flags: <defaults>
</compile_context>

<pallas_src>
import math

import jax
import jax.numpy as jnp
import numpy as np
from jax.experimental import pallas as pl
from jax.experimental.pallas import tpu as pltpu  # noqa: F401  (TPU backend assumed)

# ---- model config (small, deterministic) ----
B = 2         # batch
S = 8         # sequence length
D = 32        # d_model
H = 4         # nhead
DH = D // H   # head dim
FF = 64       # dim_feedforward
L = 2         # num_layers
EPS = 1e-5
BS = B * S

# ---- bias/norm slab geometry ----
B_ROWS_PER_LAYER = 8      # [qkv_bias, bo, b1, b2, n1w, n1b, n2w, n2b]
B_LANES = 128             # lane-dense bias/norm slab


def _layer_norm(x, w, b, eps=EPS):
    mu = jnp.mean(x, axis=-1, keepdims=True)
    xc = x - mu
    var = jnp.mean(xc * xc, axis=-1, keepdims=True)
    return xc * jax.lax.rsqrt(var + eps) * w + b


def encoder_kernel(src_ref, wqkv_ref, wo_ref, w1_ref, w2_ref, b_ref, out_ref):
    x = src_ref[...]                                   # (B*S, D) f32

    for l in range(L):                                 # static unroll over layers
        wqkv = wqkv_ref[l]                             # (D, 3D)  [Wq^T*scale | Wk^T | Wv^T]
        wo = wo_ref[l]                                 # (D, D)   Wo^T
        w1 = w1_ref[l]                                 # (D, FF)  W1^T
        w2 = w2_ref[l]                                 # (FF, D)  W2^T

        bb = l * B_ROWS_PER_LAYER
        bqkv = b_ref[bb + 0: bb + 1, 0:3 * D]          # (1, 96), bq pre-scaled
        bo = b_ref[bb + 1: bb + 2, 0:D]
        b1 = b_ref[bb + 2: bb + 3, 0:FF]
        b2 = b_ref[bb + 3: bb + 4, 0:D]
        n1w = b_ref[bb + 4: bb + 5, 0:D]
        n1b = b_ref[bb + 5: bb + 6, 0:D]
        n2w = b_ref[bb + 6: bb + 7, 0:D]
        n2b = b_ref[bb + 7: bb + 8, 0:D]

        # ---- fused QKV projection: one MXU push instead of three ----
        qkv = jnp.dot(x, wqkv, preferred_element_type=jnp.float32) + bqkv   # (BS, 3D)
        qkv3 = qkv.reshape(B, S, 3 * D)

        # ---- build a head-major (B*H, S, DH) batch (per-head lane slices +
        #      leading-axis concat; no lane-axis concat on this side) ----
        qh = jnp.concatenate(
            [qkv3[:, :, 0 * D + h * DH: 0 * D + (h + 1) * DH] for h in range(H)], axis=0)
        kh = jnp.concatenate(
            [qkv3[:, :, 1 * D + h * DH: 1 * D + (h + 1) * DH] for h in range(H)], axis=0)
        vh = jnp.concatenate(
            [qkv3[:, :, 2 * D + h * DH: 2 * D + (h + 1) * DH] for h in range(H)], axis=0)

        # ---- ONE batched attention over all B*H heads ----
        s = jnp.einsum('bqd,bkd->bqk', qh, kh,
                       preferred_element_type=jnp.float32)                  # (B*H, S, S)
        s = s - jnp.max(s, axis=-1, keepdims=True)
        p = jnp.exp(s)
        denom = jnp.sum(p, axis=-1, keepdims=True)
        r = pl.reciprocal(denom, approx=True)          # EUP slot (otherwise idle)
        r = r * (2.0 - denom * r)                      # one Newton step -> 1e-3 tolerance safe
        p = p * r
        o = jnp.einsum('bqk,bkd->bqd', p, vh,
                       preferred_element_type=jnp.float32)                  # (B*H, S, DH)

        # ---- back to (BS, D): per-head leading slices + one lane concat ----
        attn = jnp.concatenate([o[h * B:(h + 1) * B] for h in range(H)],
                               axis=-1).reshape(BS, D)
        attn = jnp.dot(attn, wo, preferred_element_type=jnp.float32) + bo

        # ---- add & norm (post-norm); dropout is identity in eval mode ----
        x = _layer_norm(x + attn, n1w, n1b)

        # ---- feed-forward ----
        hdn = jnp.maximum(jnp.dot(x, w1, preferred_element_type=jnp.float32) + b1, 0.0)
        ff = jnp.dot(hdn, w2, preferred_element_type=jnp.float32) + b2
        x = _layer_norm(x + ff, n2w, n2b)

    # ---- final TransformerEncoder norm ----
    fb = L * B_ROWS_PER_LAYER
    out_ref[...] = _layer_norm(x, b_ref[fb: fb + 1, 0:D], b_ref[fb + 1: fb + 2, 0:D])


def pack_params(params):
    """One-time (init-time) packing of the 14 stacked tensors into
    pre-transposed weight stacks + one lane-dense bias/norm slab.
    Also folds the attention scale 1/sqrt(DH) into Wq / bq for free."""
    (inpw, inpb, ow, ob, l1w, l1b, l2w, l2b,
     n1w, n1b, n2w, n2b, fnw, fnb) = params
    scale = 1.0 / math.sqrt(DH)

    wqkv = jnp.stack([inpw[l].at[:D].multiply(scale).T for l in range(L)], axis=0)  # (L, D, 3D)
    wo_t = jnp.stack([ow[l].T for l in range(L)], axis=0)                           # (L, D, D)
    w1_t = jnp.stack([l1w[l].T for l in range(L)], axis=0)                          # (L, D, FF)
    w2_t = jnp.stack([l2w[l].T for l in range(L)], axis=0)                          # (L, FF, D)

    def row(vec):
        vec = jnp.asarray(vec, jnp.float32).reshape(1, -1)
        return jnp.pad(vec, ((0, 0), (0, B_LANES - vec.shape[1])))

    rows = []
    for l in range(L):
        qkv_b = jnp.concatenate([inpb[l, 0, 0:D] * scale, inpb[l, 0, D:3 * D]])
        rows += [row(qkv_b), row(ob[l, 0]), row(l1b[l, 0]), row(l2b[l, 0]),
                 row(n1w[l, 0]), row(n1b[l, 0]), row(n2w[l, 0]), row(n2b[l, 0])]
    rows += [row(fnw[0]), row(fnb[0]), jnp.zeros((6, B_LANES), jnp.float32)]
    bslab = jnp.concatenate(rows, axis=0)                                           # (L*8 + 8, 128)
    return wqkv, wo_t, w1_t, w2_t, bslab


@jax.jit
def transformer_encoder(src, wqkv, wo_t, w1_t, w2_t, bslab):
    src2d = src.reshape(BS, D)                         # lane-dense 2-D activation slab
    out2d = pl.pallas_call(
        encoder_kernel,
        out_shape=jax.ShapeDtypeStruct((BS, D), jnp.float32),
        # no grid: whole arrays resident in VMEM (~100 KB), single invocation.
        # Scaling note: if B*S or D grows large, switch to a (BS-tile) grid with
        # grid-invariant weight blocks and set vmem_limit_bytes.
    )(src2d, wqkv, wo_t, w1_t, w2_t, bslab)
    return out2d.reshape(B, S, D)


# ---------------- pure-JAX reference (same math) ----------------
def reference_encoder(src, params):
    (inpw, inpb, ow, ob, l1w, l1b, l2w, l2b,
     n1w, n1b, n2w, n2b, fnw, fnb) = params
    x = src
    for l in range(L):
        qkv = jnp.einsum('bsd,ed->bse', x, inpw[l]) + inpb[l, 0]
        q, k, v = qkv[..., :D], qkv[..., D:2 * D], qkv[..., 2 * D:]
        scale = 1.0 / math.sqrt(DH)
        heads = []
        for h in range(H):
            sl = slice(h * DH, (h + 1) * DH)
            s = jnp.einsum('bqd,bkd->bqk', q[..., sl] * scale, k[..., sl])
            p = jax.nn.softmax(s, axis=-1)
            heads.append(jnp.einsum('bqk,bkd->bqd', p, v[..., sl]))
        attn = jnp.concatenate(heads, axis=-1)
        attn = jnp.einsum('bsd,ed->bse', attn, ow[l]) + ob[l, 0]
        x = _layer_norm(x + attn, n1w[l, 0], n1b[l, 0])
        hdn = jnp.maximum(jnp.einsum('bsd,fd->bsf', x, l1w[l]) + l1b[l, 0], 0.0)
        ff = jnp.einsum('bsf,df->bsd', hdn, l2w[l]) + l2b[l, 0]
        x = _layer_norm(x + ff, n2w[l, 0], n2b[l, 0])
    return _layer_norm(x, fnw[0], fnb[0])


def make_params(key):
    ks = jax.random.split(key, 16)
    n = lambda k, shape, s=0.05: (jax.random.normal(k, shape, jnp.float32) * s)
    inpw = n(ks[0], (L, 3 * D, D))
    inpb = n(ks[1], (L, 1, 3 * D))
    ow = n(ks[2], (L, D, D))
    ob = n(ks[3], (L, 1, D))
    l1w = n(ks[4], (L, FF, D))
    l1b = n(ks[5], (L, 1, FF))
    l2w = n(ks[6], (L, D, FF))
    l2b = n(ks[7], (L, 1, D))
    n1w = jnp.ones((L, 1, D), jnp.float32)
    n1b = jnp.zeros((L, 1, D), jnp.float32)
    n2w = jnp.ones((L, 1, D), jnp.float32)
    n2b = jnp.zeros((L, 1, D), jnp.float32)
    fnw = jnp.ones((1, D), jnp.float32)
    fnb = jnp.zeros((1, D), jnp.float32)
    return (inpw, inpb, ow, ob, l1w, l1b, l2w, l2b,
            n1w, n1b, n2w, n2b, fnw, fnb)


if __name__ == "__main__":
    key = jax.random.PRNGKey(0)
    k_src, k_par = jax.random.split(key)
    src = jax.random.normal(k_src, (B, S, D), jnp.float32)
    params = make_params(k_par)

    # Packing done ONCE at init (hoisted out of the per-call jit path).
    packed = pack_params(params)
    packed = jax.block_until_ready(packed)

    out = transformer_encoder(src, *packed)
    out = jax.block_until_ready(out)

    ref = reference_encoder(src, params)
    assert out.shape == (B, S, D)
    np.testing.assert_allclose(np.asarray(out), np.asarray(ref),
                               atol=1e-3, rtol=1e-3)
    print("KERNEL_OK")
</pallas_src>

<mosaic_0001>
module attributes {stable_mosaic.version = 11 : i64} {
  func.func @encoder_kernel(%arg0: memref<16x32xf32, #tpu.memory_space<vmem>>, %arg1: memref<2x32x96xf32, #tpu.memory_space<vmem>>, %arg2: memref<2x32x32xf32, #tpu.memory_space<vmem>>, %arg3: memref<2x32x64xf32, #tpu.memory_space<vmem>>, %arg4: memref<2x64x32xf32, #tpu.memory_space<vmem>>, %arg5: memref<24x128xf32, #tpu.memory_space<vmem>>, %arg6: memref<16x32xf32, #tpu.memory_space<vmem>>) attributes {dimension_semantics = [], scalar_prefetch = 0 : i64, scratch_operands = 0 : i64, tpu.core_type = #tpu.core_type<tc>} {
    %c0 = arith.constant 0 : index
    %c0_0 = arith.constant 0 : index
    %0 = vector.load %arg0[%c0, %c0_0] : memref<16x32xf32, #tpu.memory_space<vmem>>, vector<16x32xf32>
    %c0_1 = arith.constant 0 : index
    %c0_2 = arith.constant 0 : index
    %c0_3 = arith.constant 0 : index
    %1 = vector.load %arg1[%c0_1, %c0_2, %c0_3] : memref<2x32x96xf32, #tpu.memory_space<vmem>>, vector<1x32x96xf32>
    %2 = vector.shape_cast %1 : vector<1x32x96xf32> to vector<32x96xf32>
    %c0_4 = arith.constant 0 : index
    %c0_5 = arith.constant 0 : index
    %c0_6 = arith.constant 0 : index
    %3 = vector.load %arg2[%c0_4, %c0_5, %c0_6] : memref<2x32x32xf32, #tpu.memory_space<vmem>>, vector<1x32x32xf32>
    %4 = vector.shape_cast %3 : vector<1x32x32xf32> to vector<32x32xf32>
    %c0_7 = arith.constant 0 : index
    %c0_8 = arith.constant 0 : index
    %c0_9 = arith.constant 0 : index
    %5 = vector.load %arg3[%c0_7, %c0_8, %c0_9] : memref<2x32x64xf32, #tpu.memory_space<vmem>>, vector<1x32x64xf32>
    %6 = vector.shape_cast %5 : vector<1x32x64xf32> to vector<32x64xf32>
    %c0_10 = arith.constant 0 : index
    %c0_11 = arith.constant 0 : index
    %c0_12 = arith.constant 0 : index
    %7 = vector.load %arg4[%c0_10, %c0_11, %c0_12] : memref<2x64x32xf32, #tpu.memory_space<vmem>>, vector<1x64x32xf32>
    %8 = vector.shape_cast %7 : vector<1x64x32xf32> to vector<64x32xf32>
    %c0_13 = arith.constant 0 : index
    %c0_14 = arith.constant 0 : index
    %9 = vector.load %arg5[%c0_13, %c0_14] : memref<24x128xf32, #tpu.memory_space<vmem>>, vector<1x96xf32>
    %c1 = arith.constant 1 : index
    %c0_15 = arith.constant 0 : index
    %10 = vector.load %arg5[%c1, %c0_15] : memref<24x128xf32, #tpu.memory_space<vmem>>, vector<1x32xf32>
    %c2 = arith.constant 2 : index
    %c0_16 = arith.constant 0 : index
    %11 = vector.load %arg5[%c2, %c0_16] : memref<24x128xf32, #tpu.memory_space<vmem>>, vector<1x64xf32>
    %c3 = arith.constant 3 : index
    %c0_17 = arith.constant 0 : index
    %12 = vector.load %arg5[%c3, %c0_17] : memref<24x128xf32, #tpu.memory_space<vmem>>, vector<1x32xf32>
    %c4 = arith.constant 4 : index
    %c0_18 = arith.constant 0 : index
    %13 = vector.load %arg5[%c4, %c0_18] : memref<24x128xf32, #tpu.memory_space<vmem>>, vector<1x32xf32>
    %c5 = arith.constant 5 : index
    %c0_19 = arith.constant 0 : index
    %14 = vector.load %arg5[%c5, %c0_19] : memref<24x128xf32, #tpu.memory_space<vmem>>, vector<1x32xf32>
    %c6 = arith.constant 6 : index
    %c0_20 = arith.constant 0 : index
    %15 = vector.load %arg5[%c6, %c0_20] : memref<24x128xf32, #tpu.memory_space<vmem>>, vector<1x32xf32>
    %c7 = arith.constant 7 : index
    %c0_21 = arith.constant 0 : index
    %16 = vector.load %arg5[%c7, %c0_21] : memref<24x128xf32, #tpu.memory_space<vmem>>, vector<1x32xf32>
    %cst = arith.constant dense<0.000000e+00> : vector<16x96xf32>
    %17 = tpu.matmul %0, %2, %cst {dimension_numbers = #tpu.dot_dimension_numbers<[1], [0], [0], [1], [0, 0, 1, 1], [], []>} : vector<16x32xf32>, vector<32x96xf32>, vector<16x96xf32> -> vector<16x96xf32>
    %18 = vector.broadcast %9 : vector<1x96xf32> to vector<16x96xf32>
    %19 = arith.addf %17, %18 : vector<16x96xf32>
    %20 = vector.shape_cast %19 : vector<16x96xf32> to vector<2x8x96xf32>
    %21 = vector.extract_strided_slice %20 {offsets = [0, 0, 0], sizes = [2, 8, 8], strides = [1, 1, 1]} : vector<2x8x96xf32> to vector<2x8x8xf32>
    %22 = vector.extract_strided_slice %20 {offsets = [0, 0, 8], sizes = [2, 8, 8], strides = [1, 1, 1]} : vector<2x8x96xf32> to vector<2x8x8xf32>
    %23 = vector.extract_strided_slice %20 {offsets = [0, 0, 16], sizes = [2, 8, 8], strides = [1, 1, 1]} : vector<2x8x96xf32> to vector<2x8x8xf32>
    %24 = vector.extract_strided_slice %20 {offsets = [0, 0, 24], sizes = [2, 8, 8], strides = [1, 1, 1]} : vector<2x8x96xf32> to vector<2x8x8xf32>
    %25 = tpu.concatenate %21, %22, %23, %24 in 0 : vector<2x8x8xf32>, vector<2x8x8xf32>, vector<2x8x8xf32>, vector<2x8x8xf32> -> vector<8x8x8xf32>
    %26 = vector.extract_strided_slice %20 {offsets = [0, 0, 32], sizes = [2, 8, 8], strides = [1, 1, 1]} : vector<2x8x96xf32> to vector<2x8x8xf32>
    %27 = vector.extract_strided_slice %20 {offsets = [0, 0, 40], sizes = [2, 8, 8], strides = [1, 1, 1]} : vector<2x8x96xf32> to vector<2x8x8xf32>
    %28 = vector.extract_strided_slice %20 {offsets = [0, 0, 48], sizes = [2, 8, 8], strides = [1, 1, 1]} : vector<2x8x96xf32> to vector<2x8x8xf32>
    %29 = vector.extract_strided_slice %20 {offsets = [0, 0, 56], sizes = [2, 8, 8], strides = [1, 1, 1]} : vector<2x8x96xf32> to vector<2x8x8xf32>
    %30 = tpu.concatenate %26, %27, %28, %29 in 0 : vector<2x8x8xf32>, vector<2x8x8xf32>, vector<2x8x8xf32>, vector<2x8x8xf32> -> vector<8x8x8xf32>
    %31 = vector.extract_strided_slice %20 {offsets = [0, 0, 64], sizes = [2, 8, 8], strides = [1, 1, 1]} : vector<2x8x96xf32> to vector<2x8x8xf32>
    %32 = vector.extract_strided_slice %20 {offsets = [0, 0, 72], sizes = [2, 8, 8], strides = [1, 1, 1]} : vector<2x8x96xf32> to vector<2x8x8xf32>
    %33 = vector.extract_strided_slice %20 {offsets = [0, 0, 80], sizes = [2, 8, 8], strides = [1, 1, 1]} : vector<2x8x96xf32> to vector<2x8x8xf32>
    %34 = vector.extract_strided_slice %20 {offsets = [0, 0, 88], sizes = [2, 8, 8], strides = [1, 1, 1]} : vector<2x8x96xf32> to vector<2x8x8xf32>
    %35 = tpu.concatenate %31, %32, %33, %34 in 0 : vector<2x8x8xf32>, vector<2x8x8xf32>, vector<2x8x8xf32>, vector<2x8x8xf32> -> vector<8x8x8xf32>
    "tpu.trace_start"() <{level = 10 : i32, message = "bqd,bkd->bqk"}> : () -> ()
    %cst_22 = arith.constant dense<0.000000e+00> : vector<8x8x8xf32>
    %36 = tpu.matmul %25, %30, %cst_22 {dimension_numbers = #tpu.dot_dimension_numbers<[2], [2], [1], [1], [0, 0, 0, 1, 1, 1], [0], [0]>} : vector<8x8x8xf32>, vector<8x8x8xf32>, vector<8x8x8xf32> -> vector<8x8x8xf32>
    "tpu.trace_stop"() : () -> ()
    %cst_23 = arith.constant dense<0xFF800000> : vector<8x8xf32>
    %37 = vector.multi_reduction <maximumf>, %36, %cst_23 [2] : vector<8x8x8xf32> to vector<8x8xf32>
    %38 = vector.shape_cast %37 : vector<8x8xf32> to vector<8x8x1xf32>
    %39 = vector.broadcast %38 : vector<8x8x1xf32> to vector<8x8x8xf32>
    %40 = arith.subf %36, %39 : vector<8x8x8xf32>
    %41 = math.exp %40 : vector<8x8x8xf32>
    %cst_24 = arith.constant dense<0.000000e+00> : vector<8x8xf32>
    %42 = vector.multi_reduction <add>, %41, %cst_24 [2] : vector<8x8x8xf32> to vector<8x8xf32>
    %43 = vector.shape_cast %42 : vector<8x8xf32> to vector<8x8x1xf32>
    %44 = tpu.reciprocal %43 {approx = true} : vector<8x8x1xf32> -> vector<8x8x1xf32>
    %45 = arith.mulf %43, %44 : vector<8x8x1xf32>
    %cst_25 = arith.constant 2.000000e+00 : f32
    %46 = vector.broadcast %cst_25 : f32 to vector<8x8x1xf32>
    %47 = arith.subf %46, %45 : vector<8x8x1xf32>
    %48 = arith.mulf %44, %47 : vector<8x8x1xf32>
    %49 = vector.broadcast %48 : vector<8x8x1xf32> to vector<8x8x8xf32>
    %50 = arith.mulf %41, %49 : vector<8x8x8xf32>
    "tpu.trace_start"() <{level = 10 : i32, message = "bqk,bkd->bqd"}> : () -> ()
    %cst_26 = arith.constant dense<0.000000e+00> : vector<8x8x8xf32>
    %51 = tpu.matmul %50, %35, %cst_26 {dimension_numbers = #tpu.dot_dimension_numbers<[2], [1], [1], [2], [0, 0, 0, 1, 1, 2], [0], [0]>} : vector<8x8x8xf32>, vector<8x8x8xf32>, vector<8x8x8xf32> -> vector<8x8x8xf32>
    "tpu.trace_stop"() : () -> ()
    %52 = vector.extract_strided_slice %51 {offsets = [0, 0, 0], sizes = [2, 8, 8], strides = [1, 1, 1]} : vector<8x8x8xf32> to vector<2x8x8xf32>
    %53 = vector.extract_strided_slice %51 {offsets = [2, 0, 0], sizes = [2, 8, 8], strides = [1, 1, 1]} : vector<8x8x8xf32> to vector<2x8x8xf32>
    %54 = vector.extract_strided_slice %51 {offsets = [4, 0, 0], sizes = [2, 8, 8], strides = [1, 1, 1]} : vector<8x8x8xf32> to vector<2x8x8xf32>
    %55 = vector.extract_strided_slice %51 {offsets = [6, 0, 0], sizes = [2, 8, 8], strides = [1, 1, 1]} : vector<8x8x8xf32> to vector<2x8x8xf32>
    %56 = tpu.concatenate %52, %53, %54, %55 in 2 : vector<2x8x8xf32>, vector<2x8x8xf32>, vector<2x8x8xf32>, vector<2x8x8xf32> -> vector<2x8x32xf32>
    %57 = vector.shape_cast %56 : vector<2x8x32xf32> to vector<16x32xf32>
    %cst_27 = arith.constant dense<0.000000e+00> : vector<16x32xf32>
    %58 = tpu.matmul %57, %4, %cst_27 {dimension_numbers = #tpu.dot_dimension_numbers<[1], [0], [0], [1], [0, 0, 1, 1], [], []>} : vector<16x32xf32>, vector<32x32xf32>, vector<16x32xf32> -> vector<16x32xf32>
    %59 = vector.broadcast %10 : vector<1x32xf32> to vector<16x32xf32>
    %60 = arith.addf %58, %59 : vector<16x32xf32>
    %61 = arith.addf %0, %60 : vector<16x32xf32>
    %cst_28 = arith.constant dense<0.000000e+00> : vector<16xf32>
    %62 = vector.multi_reduction <add>, %61, %cst_28 [1] : vector<16x32xf32> to vector<16xf32>
    %63 = vector.shape_cast %62 : vector<16xf32> to vector<16x1xf32>
    %cst_29 = arith.constant 3.200000e+01 : f32
    %64 = vector.broadcast %cst_29 : f32 to vector<16x1xf32>
    %65 = arith.divf %63, %64 : vector<16x1xf32>
    %66 = vector.broadcast %65 : vector<16x1xf32> to vector<16x32xf32>
    %67 = arith.subf %61, %66 : vector<16x32xf32>
    %68 = arith.mulf %67, %67 : vector<16x32xf32>
    %cst_30 = arith.constant dense<0.000000e+00> : vector<16xf32>
    %69 = vector.multi_reduction <add>, %68, %cst_30 [1] : vector<16x32xf32> to vector<16xf32>
    %70 = vector.shape_cast %69 : vector<16xf32> to vector<16x1xf32>
    %cst_31 = arith.constant 3.200000e+01 : f32
    %71 = vector.broadcast %cst_31 : f32 to vector<16x1xf32>
    %72 = arith.divf %70, %71 : vector<16x1xf32>
    %cst_32 = arith.constant 9.99999974E-6 : f32
    %73 = vector.broadcast %cst_32 : f32 to vector<16x1xf32>
    %74 = arith.addf %72, %73 : vector<16x1xf32>
    %75 = math.rsqrt %74 : vector<16x1xf32>
    %76 = vector.broadcast %75 : vector<16x1xf32> to vector<16x32xf32>
    %77 = arith.mulf %67, %76 : vector<16x32xf32>
    %78 = vector.broadcast %13 : vector<1x32xf32> to vector<16x32xf32>
    %79 = arith.mulf %77, %78 : vector<16x32xf32>
    %80 = vector.broadcast %14 : vector<1x32xf32> to vector<16x32xf32>
    %81 = arith.addf %79, %80 : vector<16x32xf32>
    %cst_33 = arith.constant dense<0.000000e+00> : vector<16x64xf32>
    %82 = tpu.matmul %81, %6, %cst_33 {dimension_numbers = #tpu.dot_dimension_numbers<[1], [0], [0], [1], [0, 0, 1, 1], [], []>} : vector<16x32xf32>, vector<32x64xf32>, vector<16x64xf32> -> vector<16x64xf32>
    %83 = vector.broadcast %11 : vector<1x64xf32> to vector<16x64xf32>
    %84 = arith.addf %82, %83 : vector<16x64xf32>
    %cst_34 = arith.constant 0.000000e+00 : f32
    %85 = vector.broadcast %cst_34 : f32 to vector<16x64xf32>
    %86 = arith.maximumf %84, %85 : vector<16x64xf32>
    %cst_35 = arith.constant dense<0.000000e+00> : vector<16x32xf32>
    %87 = tpu.matmul %86, %8, %cst_35 {dimension_numbers = #tpu.dot_dimension_numbers<[1], [0], [0], [1], [0, 0, 1, 1], [], []>} : vector<16x64xf32>, vector<64x32xf32>, vector<16x32xf32> -> vector<16x32xf32>
    %88 = vector.broadcast %12 : vector<1x32xf32> to vector<16x32xf32>
    %89 = arith.addf %87, %88 : vector<16x32xf32>
    %90 = arith.addf %81, %89 : vector<16x32xf32>
    %cst_36 = arith.constant dense<0.000000e+00> : vector<16xf32>
    %91 = vector.multi_reduction <add>, %90, %cst_36 [1] : vector<16x32xf32> to vector<16xf32>
    %92 = vector.shape_cast %91 : vector<16xf32> to vector<16x1xf32>
    %cst_37 = arith.constant 3.200000e+01 : f32
    %93 = vector.broadcast %cst_37 : f32 to vector<16x1xf32>
    %94 = arith.divf %92, %93 : vector<16x1xf32>
    %95 = vector.broadcast %94 : vector<16x1xf32> to vector<16x32xf32>
    %96 = arith.subf %90, %95 : vector<16x32xf32>
    %97 = arith.mulf %96, %96 : vector<16x32xf32>
    %cst_38 = arith.constant dense<0.000000e+00> : vector<16xf32>
    %98 = vector.multi_reduction <add>, %97, %cst_38 [1] : vector<16x32xf32> to vector<16xf32>
    %99 = vector.shape_cast %98 : vector<16xf32> to vector<16x1xf32>
    %cst_39 = arith.constant 3.200000e+01 : f32
    %100 = vector.broadcast %cst_39 : f32 to vector<16x1xf32>
    %101 = arith.divf %99, %100 : vector<16x1xf32>
    %cst_40 = arith.constant 9.99999974E-6 : f32
    %102 = vector.broadcast %cst_40 : f32 to vector<16x1xf32>
    %103 = arith.addf %101, %102 : vector<16x1xf32>
    %104 = math.rsqrt %103 : vector<16x1xf32>
    %105 = vector.broadcast %104 : vector<16x1xf32> to vector<16x32xf32>
    %106 = arith.mulf %96, %105 : vector<16x32xf32>
    %107 = vector.broadcast %15 : vector<1x32xf32> to vector<16x32xf32>
    %108 = arith.mulf %106, %107 : vector<16x32xf32>
    %109 = vector.broadcast %16 : vector<1x32xf32> to vector<16x32xf32>
    %110 = arith.addf %108, %109 : vector<16x32xf32>
    %c1_41 = arith.constant 1 : index
    %c0_42 = arith.constant 0 : index
    %c0_43 = arith.constant 0 : index
    %111 = vector.load %arg1[%c1_41, %c0_42, %c0_43] : memref<2x32x96xf32, #tpu.memory_space<vmem>>, vector<1x32x96xf32>
    %112 = vector.shape_cast %111 : vector<1x32x96xf32> to vector<32x96xf32>
    %c1_44 = arith.constant 1 : index
    %c0_45 = arith.constant 0 : index
    %c0_46 = arith.constant 0 : index
    %113 = vector.load %arg2[%c1_44, %c0_45, %c0_46] : memref<2x32x32xf32, #tpu.memory_space<vmem>>, vector<1x32x32xf32>
    %114 = vector.shape_cast %113 : vector<1x32x32xf32> to vector<32x32xf32>
    %c1_47 = arith.constant 1 : index
    %c0_48 = arith.constant 0 : index
    %c0_49 = arith.constant 0 : index
    %115 = vector.load %arg3[%c1_47, %c0_48, %c0_49] : memref<2x32x64xf32, #tpu.memory_space<vmem>>, vector<1x32x64xf32>
    %116 = vector.shape_cast %115 : vector<1x32x64xf32> to vector<32x64xf32>
    %c1_50 = arith.constant 1 : index
    %c0_51 = arith.constant 0 : index
    %c0_52 = arith.constant 0 : index
    %117 = vector.load %arg4[%c1_50, %c0_51, %c0_52] : memref<2x64x32xf32, #tpu.memory_space<vmem>>, vector<1x64x32xf32>
    %118 = vector.shape_cast %117 : vector<1x64x32xf32> to vector<64x32xf32>
    %c8 = arith.constant 8 : index
    %c0_53 = arith.constant 0 : index
    %119 = vector.load %arg5[%c8, %c0_53] : memref<24x128xf32, #tpu.memory_space<vmem>>, vector<1x96xf32>
    %c9 = arith.constant 9 : index
    %c0_54 = arith.constant 0 : index
    %120 = vector.load %arg5[%c9, %c0_54] : memref<24x128xf32, #tpu.memory_space<vmem>>, vector<1x32xf32>
    %c10 = arith.constant 10 : index
    %c0_55 = arith.constant 0 : index
    %121 = vector.load %arg5[%c10, %c0_55] : memref<24x128xf32, #tpu.memory_space<vmem>>, vector<1x64xf32>
    %c11 = arith.constant 11 : index
    %c0_56 = arith.constant 0 : index
    %122 = vector.load %arg5[%c11, %c0_56] : memref<24x128xf32, #tpu.memory_space<vmem>>, vector<1x32xf32>
    %c12 = arith.constant 12 : index
    %c0_57 = arith.constant 0 : index
    %123 = vector.load %arg5[%c12, %c0_57] : memref<24x128xf32, #tpu.memory_space<vmem>>, vector<1x32xf32>
    %c13 = arith.constant 13 : index
    %c0_58 = arith.constant 0 : index
    %124 = vector.load %arg5[%c13, %c0_58] : memref<24x128xf32, #tpu.memory_space<vmem>>, vector<1x32xf32>
    %c14 = arith.constant 14 : index
    %c0_59 = arith.constant 0 : index
    %125 = vector.load %arg5[%c14, %c0_59] : memref<24x128xf32, #tpu.memory_space<vmem>>, vector<1x32xf32>
    %c15 = arith.constant 15 : index
    %c0_60 = arith.constant 0 : index
    %126 = vector.load %arg5[%c15, %c0_60] : memref<24x128xf32, #tpu.memory_space<vmem>>, vector<1x32xf32>
    %cst_61 = arith.constant dense<0.000000e+00> : vector<16x96xf32>
    %127 = tpu.matmul %110, %112, %cst_61 {dimension_numbers = #tpu.dot_dimension_numbers<[1], [0], [0], [1], [0, 0, 1, 1], [], []>} : vector<16x32xf32>, vector<32x96xf32>, vector<16x96xf32> -> vector<16x96xf32>
    %128 = vector.broadcast %119 : vector<1x96xf32> to vector<16x96xf32>
    %129 = arith.addf %127, %128 : vector<16x96xf32>
    %130 = vector.shape_cast %129 : vector<16x96xf32> to vector<2x8x96xf32>
    %131 = vector.extract_strided_slice %130 {offsets = [0, 0, 0], sizes = [2, 8, 8], strides = [1, 1, 1]} : vector<2x8x96xf32> to vector<2x8x8xf32>
    %132 = vector.extract_strided_slice %130 {offsets = [0, 0, 8], sizes = [2, 8, 8], strides = [1, 1, 1]} : vector<2x8x96xf32> to vector<2x8x8xf32>
    %133 = vector.extract_strided_slice %130 {offsets = [0, 0, 16], sizes = [2, 8, 8], strides = [1, 1, 1]} : vector<2x8x96xf32> to vector<2x8x8xf32>
    %134 = vector.extract_strided_slice %130 {offsets = [0, 0, 24], sizes = [2, 8, 8], strides = [1, 1, 1]} : vector<2x8x96xf32> to vector<2x8x8xf32>
    %135 = tpu.concatenate %131, %132, %133, %134 in 0 : vector<2x8x8xf32>, vector<2x8x8xf32>, vector<2x8x8xf32>, vector<2x8x8xf32> -> vector<8x8x8xf32>
    %136 = vector.extract_strided_slice %130 {offsets = [0, 0, 32], sizes = [2, 8, 8], strides = [1, 1, 1]} : vector<2x8x96xf32> to vector<2x8x8xf32>
    %137 = vector.extract_strided_slice %130 {offsets = [0, 0, 40], sizes = [2, 8, 8], strides = [1, 1, 1]} : vector<2x8x96xf32> to vector<2x8x8xf32>
    %138 = vector.extract_strided_slice %130 {offsets = [0, 0, 48], sizes = [2, 8, 8], strides = [1, 1, 1]} : vector<2x8x96xf32> to vector<2x8x8xf32>
    %139 = vector.extract_strided_slice %130 {offsets = [0, 0, 56], sizes = [2, 8, 8], strides = [1, 1, 1]} : vector<2x8x96xf32> to vector<2x8x8xf32>
    %140 = tpu.concatenate %136, %137, %138, %139 in 0 : vector<2x8x8xf32>, vector<2x8x8xf32>, vector<2x8x8xf32>, vector<2x8x8xf32> -> vector<8x8x8xf32>
    %141 = vector.extract_strided_slice %130 {offsets = [0, 0, 64], sizes = [2, 8, 8], strides = [1, 1, 1]} : vector<2x8x96xf32> to vector<2x8x8xf32>
    %142 = vector.extract_strided_slice %130 {offsets = [0, 0, 72], sizes = [2, 8, 8], strides = [1, 1, 1]} : vector<2x8x96xf32> to vector<2x8x8xf32>
    %143 = vector.extract_strided_slice %130 {offsets = [0, 0, 80], sizes = [2, 8, 8], strides = [1, 1, 1]} : vector<2x8x96xf32> to vector<2x8x8xf32>
    %144 = vector.extract_strided_slice %130 {offsets = [0, 0, 88], sizes = [2, 8, 8], strides = [1, 1, 1]} : vector<2x8x96xf32> to vector<2x8x8xf32>
    %145 = tpu.concatenate %141, %142, %143, %144 in 0 : vector<2x8x8xf32>, vector<2x8x8xf32>, vector<2x8x8xf32>, vector<2x8x8xf32> -> vector<8x8x8xf32>
    "tpu.trace_start"() <{level = 10 : i32, message = "bqd,bkd->bqk"}> : () -> ()
    %cst_62 = arith.constant dense<0.000000e+00> : vector<8x8x8xf32>
    %146 = tpu.matmul %135, %140, %cst_62 {dimension_numbers = #tpu.dot_dimension_numbers<[2], [2], [1], [1], [0, 0, 0, 1, 1, 1], [0], [0]>} : vector<8x8x8xf32>, vector<8x8x8xf32>, vector<8x8x8xf32> -> vector<8x8x8xf32>
    "tpu.trace_stop"() : () -> ()
    %cst_63 = arith.constant dense<0xFF800000> : vector<8x8xf32>
    %147 = vector.multi_reduction <maximumf>, %146, %cst_63 [2] : vector<8x8x8xf32> to vector<8x8xf32>
    %148 = vector.shape_cast %147 : vector<8x8xf32> to vector<8x8x1xf32>
    %149 = vector.broadcast %148 : vector<8x8x1xf32> to vector<8x8x8xf32>
    %150 = arith.subf %146, %149 : vector<8x8x8xf32>
    %151 = math.exp %150 : vector<8x8x8xf32>
    %cst_64 = arith.constant dense<0.000000e+00> : vector<8x8xf32>
    %152 = vector.multi_reduction <add>, %151, %cst_64 [2] : vector<8x8x8xf32> to vector<8x8xf32>
    %153 = vector.shape_cast %152 : vector<8x8xf32> to vector<8x8x1xf32>
    %154 = tpu.reciprocal %153 {approx = true} : vector<8x8x1xf32> -> vector<8x8x1xf32>
    %155 = arith.mulf %153, %154 : vector<8x8x1xf32>
    %cst_65 = arith.constant 2.000000e+00 : f32
    %156 = vector.broadcast %cst_65 : f32 to vector<8x8x1xf32>
    %157 = arith.subf %156, %155 : vector<8x8x1xf32>
    %158 = arith.mulf %154, %157 : vector<8x8x1xf32>
    %159 = vector.broadcast %158 : vector<8x8x1xf32> to vector<8x8x8xf32>
    %160 = arith.mulf %151, %159 : vector<8x8x8xf32>
    "tpu.trace_start"() <{level = 10 : i32, message = "bqk,bkd->bqd"}> : () -> ()
    %cst_66 = arith.constant dense<0.000000e+00> : vector<8x8x8xf32>
    %161 = tpu.matmul %160, %145, %cst_66 {dimension_numbers = #tpu.dot_dimension_numbers<[2], [1], [1], [2], [0, 0, 0, 1, 1, 2], [0], [0]>} : vector<8x8x8xf32>, vector<8x8x8xf32>, vector<8x8x8xf32> -> vector<8x8x8xf32>
    "tpu.trace_stop"() : () -> ()
    %162 = vector.extract_strided_slice %161 {offsets = [0, 0, 0], sizes = [2, 8, 8], strides = [1, 1, 1]} : vector<8x8x8xf32> to vector<2x8x8xf32>
    %163 = vector.extract_strided_slice %161 {offsets = [2, 0, 0], sizes = [2, 8, 8], strides = [1, 1, 1]} : vector<8x8x8xf32> to vector<2x8x8xf32>
    %164 = vector.extract_strided_slice %161 {offsets = [4, 0, 0], sizes = [2, 8, 8], strides = [1, 1, 1]} : vector<8x8x8xf32> to vector<2x8x8xf32>
    %165 = vector.extract_strided_slice %161 {offsets = [6, 0, 0], sizes = [2, 8, 8], strides = [1, 1, 1]} : vector<8x8x8xf32> to vector<2x8x8xf32>
    %166 = tpu.concatenate %162, %163, %164, %165 in 2 : vector<2x8x8xf32>, vector<2x8x8xf32>, vector<2x8x8xf32>, vector<2x8x8xf32> -> vector<2x8x32xf32>
    %167 = vector.shape_cast %166 : vector<2x8x32xf32> to vector<16x32xf32>
    %cst_67 = arith.constant dense<0.000000e+00> : vector<16x32xf32>
    %168 = tpu.matmul %167, %114, %cst_67 {dimension_numbers = #tpu.dot_dimension_numbers<[1], [0], [0], [1], [0, 0, 1, 1], [], []>} : vector<16x32xf32>, vector<32x32xf32>, vector<16x32xf32> -> vector<16x32xf32>
    %169 = vector.broadcast %120 : vector<1x32xf32> to vector<16x32xf32>
    %170 = arith.addf %168, %169 : vector<16x32xf32>
    %171 = arith.addf %110, %170 : vector<16x32xf32>
    %cst_68 = arith.constant dense<0.000000e+00> : vector<16xf32>
    %172 = vector.multi_reduction <add>, %171, %cst_68 [1] : vector<16x32xf32> to vector<16xf32>
    %173 = vector.shape_cast %172 : vector<16xf32> to vector<16x1xf32>
    %cst_69 = arith.constant 3.200000e+01 : f32
    %174 = vector.broadcast %cst_69 : f32 to vector<16x1xf32>
    %175 = arith.divf %173, %174 : vector<16x1xf32>
    %176 = vector.broadcast %175 : vector<16x1xf32> to vector<16x32xf32>
    %177 = arith.subf %171, %176 : vector<16x32xf32>
    %178 = arith.mulf %177, %177 : vector<16x32xf32>
    %cst_70 = arith.constant dense<0.000000e+00> : vector<16xf32>
    %179 = vector.multi_reduction <add>, %178, %cst_70 [1] : vector<16x32xf32> to vector<16xf32>
    %180 = vector.shape_cast %179 : vector<16xf32> to vector<16x1xf32>
    %cst_71 = arith.constant 3.200000e+01 : f32
    %181 = vector.broadcast %cst_71 : f32 to vector<16x1xf32>
    %182 = arith.divf %180, %181 : vector<16x1xf32>
    %cst_72 = arith.constant 9.99999974E-6 : f32
    %183 = vector.broadcast %cst_72 : f32 to vector<16x1xf32>
    %184 = arith.addf %182, %183 : vector<16x1xf32>
    %185 = math.rsqrt %184 : vector<16x1xf32>
    %186 = vector.broadcast %185 : vector<16x1xf32> to vector<16x32xf32>
    %187 = arith.mulf %177, %186 : vector<16x32xf32>
    %188 = vector.broadcast %123 : vector<1x32xf32> to vector<16x32xf32>
    %189 = arith.mulf %187, %188 : vector<16x32xf32>
    %190 = vector.broadcast %124 : vector<1x32xf32> to vector<16x32xf32>
    %191 = arith.addf %189, %190 : vector<16x32xf32>
    %cst_73 = arith.constant dense<0.000000e+00> : vector<16x64xf32>
    %192 = tpu.matmul %191, %116, %cst_73 {dimension_numbers = #tpu.dot_dimension_numbers<[1], [0], [0], [1], [0, 0, 1, 1], [], []>} : vector<16x32xf32>, vector<32x64xf32>, vector<16x64xf32> -> vector<16x64xf32>
    %193 = vector.broadcast %121 : vector<1x64xf32> to vector<16x64xf32>
    %194 = arith.addf %192, %193 : vector<16x64xf32>
    %cst_74 = arith.constant 0.000000e+00 : f32
    %195 = vector.broadcast %cst_74 : f32 to vector<16x64xf32>
    %196 = arith.maximumf %194, %195 : vector<16x64xf32>
    %cst_75 = arith.constant dense<0.000000e+00> : vector<16x32xf32>
    %197 = tpu.matmul %196, %118, %cst_75 {dimension_numbers = #tpu.dot_dimension_numbers<[1], [0], [0], [1], [0, 0, 1, 1], [], []>} : vector<16x64xf32>, vector<64x32xf32>, vector<16x32xf32> -> vector<16x32xf32>
    %198 = vector.broadcast %122 : vector<1x32xf32> to vector<16x32xf32>
    %199 = arith.addf %197, %198 : vector<16x32xf32>
    %200 = arith.addf %191, %199 : vector<16x32xf32>
    %cst_76 = arith.constant dense<0.000000e+00> : vector<16xf32>
    %201 = vector.multi_reduction <add>, %200, %cst_76 [1] : vector<16x32xf32> to vector<16xf32>
    %202 = vector.shape_cast %201 : vector<16xf32> to vector<16x1xf32>
    %cst_77 = arith.constant 3.200000e+01 : f32
    %203 = vector.broadcast %cst_77 : f32 to vector<16x1xf32>
    %204 = arith.divf %202, %203 : vector<16x1xf32>
    %205 = vector.broadcast %204 : vector<16x1xf32> to vector<16x32xf32>
    %206 = arith.subf %200, %205 : vector<16x32xf32>
    %207 = arith.mulf %206, %206 : vector<16x32xf32>
    %cst_78 = arith.constant dense<0.000000e+00> : vector<16xf32>
    %208 = vector.multi_reduction <add>, %207, %cst_78 [1] : vector<16x32xf32> to vector<16xf32>
    %209 = vector.shape_cast %208 : vector<16xf32> to vector<16x1xf32>
    %cst_79 = arith.constant 3.200000e+01 : f32
    %210 = vector.broadcast %cst_79 : f32 to vector<16x1xf32>
    %211 = arith.divf %209, %210 : vector<16x1xf32>
    %cst_80 = arith.constant 9.99999974E-6 : f32
    %212 = vector.broadcast %cst_80 : f32 to vector<16x1xf32>
    %213 = arith.addf %211, %212 : vector<16x1xf32>
    %214 = math.rsqrt %213 : vector<16x1xf32>
    %215 = vector.broadcast %214 : vector<16x1xf32> to vector<16x32xf32>
    %216 = arith.mulf %206, %215 : vector<16x32xf32>
    %217 = vector.broadcast %125 : vector<1x32xf32> to vector<16x32xf32>
    %218 = arith.mulf %216, %217 : vector<16x32xf32>
    %219 = vector.broadcast %126 : vector<1x32xf32> to vector<16x32xf32>
    %220 = arith.addf %218, %219 : vector<16x32xf32>
    %c16 = arith.constant 16 : index
    %c0_81 = arith.constant 0 : index
    %221 = vector.load %arg5[%c16, %c0_81] : memref<24x128xf32, #tpu.memory_space<vmem>>, vector<1x32xf32>
    %c17 = arith.constant 17 : index
    %c0_82 = arith.constant 0 : index
    %222 = vector.load %arg5[%c17, %c0_82] : memref<24x128xf32, #tpu.memory_space<vmem>>, vector<1x32xf32>
    %cst_83 = arith.constant dense<0.000000e+00> : vector<16xf32>
    %223 = vector.multi_reduction <add>, %220, %cst_83 [1] : vector<16x32xf32> to vector<16xf32>
    %224 = vector.shape_cast %223 : vector<16xf32> to vector<16x1xf32>
    %cst_84 = arith.constant 3.200000e+01 : f32
    %225 = vector.broadcast %cst_84 : f32 to vector<16x1xf32>
    %226 = arith.divf %224, %225 : vector<16x1xf32>
    %227 = vector.broadcast %226 : vector<16x1xf32> to vector<16x32xf32>
    %228 = arith.subf %220, %227 : vector<16x32xf32>
    %229 = arith.mulf %228, %228 : vector<16x32xf32>
    %cst_85 = arith.constant dense<0.000000e+00> : vector<16xf32>
    %230 = vector.multi_reduction <add>, %229, %cst_85 [1] : vector<16x32xf32> to vector<16xf32>
    %231 = vector.shape_cast %230 : vector<16xf32> to vector<16x1xf32>
    %cst_86 = arith.constant 3.200000e+01 : f32
    %232 = vector.broadcast %cst_86 : f32 to vector<16x1xf32>
    %233 = arith.divf %231, %232 : vector<16x1xf32>
    %cst_87 = arith.constant 9.99999974E-6 : f32
    %234 = vector.broadcast %cst_87 : f32 to vector<16x1xf32>
    %235 = arith.addf %233, %234 : vector<16x1xf32>
    %236 = math.rsqrt %235 : vector<16x1xf32>
    %237 = vector.broadcast %236 : vector<16x1xf32> to vector<16x32xf32>
    %238 = arith.mulf %228, %237 : vector<16x32xf32>
    %239 = vector.broadcast %221 : vector<1x32xf32> to vector<16x32xf32>
    %240 = arith.mulf %238, %239 : vector<16x32xf32>
    %241 = vector.broadcast %222 : vector<1x32xf32> to vector<16x32xf32>
    %242 = arith.addf %240, %241 : vector<16x32xf32>
    %c0_88 = arith.constant 0 : index
    %c0_89 = arith.constant 0 : index
    %243 = vector.load %arg6[%c0_88, %c0_89] : memref<16x32xf32, #tpu.memory_space<vmem>>, vector<16x32xf32>
    tpu.vector_store %arg6[%c0_88, %c0_89], %242 {strides = array<i32>} : memref<16x32xf32, #tpu.memory_space<vmem>>, vector<16x32xf32>,
    return
  }
}

</mosaic_0001>

<bundles_post_ra>
// kernel: transformer_encoder.1
= control target key start
LH: loop header
LB: loop body
LE: loop exit
PB: predicated region body
PF: predicated region fallthrough
CT: control target
= control target key end

     0   :  { %11 = vsyncpa [#allocation3], 0  ;;  %s5178_s0 = inlined_call_operand.hbm [shape: f32[16,32], index: 0, kind: input, shape index: {}]   ;;  %s5179_s1 = inlined_call_operand.vmem [shape: f32[2,32,96], index: 1, kind: input, shape index: {}]   ;;  %s5180_s2 = inlined_call_operand.vmem [shape: f32[2,32,32], index: 2, kind: input, shape index: {}]   ;;  %s5181_s3 = inlined_call_operand.vmem [shape: f32[2,32,64], index: 3, kind: input, shape index: {}]   ;;  %s5182_s4 = inlined_call_operand.vmem [shape: f32[2,64,32], index: 4, kind: input, shape index: {}]   ;;  %s5183_s5 = inlined_call_operand.hbm [shape: f32[24,128], index: 5, kind: input, shape index: {}]   ;;  %s5184_s6 = inlined_call_operand.hbm [shape: f32[16,32], index: 6, kind: output, shape index: {}]  }
   0x1   :  { %12 = vsyncpa [#allocation6], 0 }
   0x2   :  { %13 = vsyncpa [#allocation4], 0  ;;  %s4504_s21 = smov [#allocation2]   ;;  %s4432_s25 = scalar_lea.hbm %s5178_s0, 256 }
   0x3   :  { %s19_s22 = sshll.u32 %s4504_s21, 4  ;;  %p4433_p0 = scmp.ne.s32.totalorder %s5178_s0, %s4432_s25  ;;  %s20_s22 = int_to_ptr.vmem [resolvable:$true] %s19_s22 }
   0x4   :  { %p4436_p1 = scmp.lt.u32.totalorder %s4432_s25, %s5178_s0 }
   0x6   :  { %p4438_p2 = pnand %p4436_p1, %p4433_p0 }
   0x8   :  { %4441 = shalt.err (!%p4438_p2)
}
   0x9   :  { %s4442_s30 = scalar_lea.vmem %s20_s22, 256  ;;  %p4447_p4 = scmp.lt.s32.totalorder %s20_s22, %s20_s22 }
   0xa   :  { %p4443_p3 = scmp.ne.s32.totalorder %s20_s22, %s4442_s30  ;;  %p4448_p5 = scmp.lt.s32.totalorder %s4442_s30, %s4442_s30 }
   0xc   :  { %p4449_p6 = por %p4448_p5, %p4447_p4 }
   0xe   :  { %p4450_p7 = pnand %p4449_p6, %p4443_p3 }
  0x10   :  { %4453 = shalt.err (!%p4450_p7)
}
  0x11   :  { %s4505_s7 = smov 128   ;;  %s4506_s8 = smov 8  }
  0x12   :  { %25 = dma.hbm_to_vmem [thread:$0]  %s5178_s0, 256, %s20_s22, [#allocation3], %s4505_s7, %s4505_s7, %s4506_s8  }
  0x13   :  { %s4507_s11 = smov [#allocation5]   ;;  %s4454_s15 = scalar_lea.hbm %s5183_s5, 384 }
  0x14   :  { %s39_s12 = sshll.u32 %s4507_s11, 4  ;;  %p4455_p8 = scmp.ne.s32.totalorder %s5183_s5, %s4454_s15  ;;  %s40_s12 = int_to_ptr.vmem [resolvable:$true] %s39_s12 }
  0x15   :  { %p4458_p9 = scmp.lt.u32.totalorder %s4454_s15, %s5183_s5 }
  0x17   :  { %p4460_p10 = pnand %p4458_p9, %p4455_p8 }
  0x19   :  { %4463 = shalt.err (!%p4460_p10)
}
  0x1a   :  { %s4464_s20 = scalar_lea.vmem %s40_s12, 384  ;;  %p4469_p12 = scmp.lt.s32.totalorder %s40_s12, %s40_s12 }
  0x1b   :  { %p4465_p11 = scmp.ne.s32.totalorder %s40_s12, %s4464_s20  ;;  %p4470_p13 = scmp.lt.s32.totalorder %s4464_s20, %s4464_s20 }
  0x1d   :  { %p4471_p0 = por %p4470_p13, %p4469_p12 }
  0x1f   :  { %p4472_p1 = pnand %p4471_p0, %p4465_p11 }
  0x21   :  { %4475 = shalt.err (!%p4472_p1)
}
  0x22   :  { %45 = dma.hbm_to_vmem [thread:$0]  %s5183_s5, 384, %s40_s12, [#allocation6], %s4505_s7, %s4505_s7, %s4506_s8  }
  0x23   :  { %4498 = dma.done.wait [#allocation3], 256  }
  0x24   :  { %4499 = vsyncadd [#allocation3], 4294967040 }
  0x25   :  { %4500 = dma.done.wait [#allocation6], 384  }
  0x26   :  { %4501 = vsyncadd [#allocation6], 4294966912  ;;  %vm86_vm0 = vcmask 261120   ;;  %v54_v0 = vld [vmem:[%s5179_s1] sm:$0xff]  ;;  %v55_v1 = vld [vmem:[%s5179_s1 + $0x8] sm:$0xff]  ;;  %v4508_v10 = vmov 0.0  }
  0x27   :  { %v56_v2 = vld [vmem:[%s5179_s1 + $0x10] sm:$0xff]  ;;  %v4254_v3 = vpack.c.bf16 %v55_v1, %v54_v0  ;;  %v57_v4 = vld [vmem:[%s5179_s1 + $0x18] sm:$0xff]  ;;  %v4595_v5 = vld [vmem:[#allocation2] sm:$0xff]  ;;  %4011 = vmatprep.subr.mxu0 %v4508_v10  ;;  %s4509_s29 = smov 112   ;;  %s4510_s30 = smov 120   ;;  %vm4511_vm1 = vmmov 0  }
  0x28   :  { %v4258_v6 = vpack.c.bf16 %v57_v4, %v56_v2  ;;  %3998 = vmatprep.mubr.msk.f32.mxu1 %vm86_vm0, %v4595_v5  ;;  %v4599_v7 = vld [vmem:[#allocation2 + $0x8] sm:$0xff]  ;;  %v3768_v8 = vld [vmem:[#allocation5] ss:$0 sm:$0xff]  ;;  %4013 = vmatprep.mubr.msk.f32.mxu0 %vm4511_vm1, %v4508_v10  ;;  %s4512_s9 = smov 104   ;;  %s4513_s10 = smov 96   ;;  %vm184_vm2 = vcmask 64512  }
  0x29   :  { %4255 = vmatprep.subr.bf16.mxu1 %v4254_v3  ;;  %s4514_s11 = smov 64   ;;  %s4515_s20 = smov 16   ;;  %vm1537_vm3 = vcmask 130048   ;;  %vm1540_vm4 = vcmask 195584   ;;  %vm1760_vm5 = vcmask 523264  }
  0x2a   :  { %4257 = vmatpush3.bf16.msra.mxu1 %v4254_v3  ;;  %s4516_s0 = smov 24  }
  0x2b   :  { %4259 = vmatprep.subr.bf16.mxu1 %v4258_v6 }
  0x2e   :  { %4261 = vmatpush3.bf16.msra.mxu1 %v4258_v6 }
  0x2f   :  { %4001 = vmatprep.subr.mxu1 %v4508_v10 }
  0x31   :  { %3999 = vmatmul.mubr.msk.f32.vlgmr.msra.gmra.mrb[0].mxu1 %vm86_vm0, %v4599_v7 }
  0x32   :  { %4003 = vmatprep.mubr.msk.f32.mxu1 %vm4511_vm1, %v4508_v10 }
 0x104   :  { %v4000_v9 = vpop.f32.mrb[0].mxu1 }
 0x105   :  { %v159_v11 = vpop.f32.mrb[1].mxu1  ;;  %v4615_v13 = vadd.f32 %v4000_v9, %v3768_v8 }
 0x106   :  { %v4605_v12 = vadd.f32 %v3768_v8, %v159_v11 }
 0x108   :  { %174 = vrot.lane.b32.xlu1 %v4605_v12, %s4509_s29  ;;  %170 = vrot.lane.b32.xlu0 %v4605_v12, %s4510_s30 }
 0x10c   :  { %176 = vrot.lane.b32.xlu1 %v4615_v13, %s4509_s29  ;;  %172 = vrot.lane.b32.xlu0 %v4615_v13, %s4510_s30 }
 0x110   :  { %180 = vrot.lane.b32.xlu1 %v4615_v13, %s4512_s9  ;;  %178 = vrot.lane.b32.xlu0 %v4605_v12, %s4512_s9 }
 0x114   :  { %259 = vrot.lane.b32.xlu1 %v4615_v13, %s4513_s10  ;;  %182 = vrot.lane.b32.xlu0 %v4605_v12, %s4513_s10 }
 0x17a   :  { %v4629_v14 = vpop.permute.xlu1 %174  ;;  %v4631_v15 = vpop.permute.xlu0 %170 }
 0x17b   :  { %335 = vrot.lane.b32.xlu0 %v4631_v15, %s4513_s10 }
 0x17e   :  { %v4635_v16 = vpop.permute.xlu1 %176  ;;  %v4637_v17 = vpop.permute.xlu0 %172 }
 0x17f   :  { %487 = vrot.lane.b32.xlu0 %v4629_v14, %s4513_s10  ;;  %411 = vrot.lane.b32.xlu1 %v4637_v17, %s4513_s10 }
 0x182   :  { %v4643_v18 = vpop.permute.xlu0 %178  ;;  %v4649_v19 = vpop.permute.xlu1 %180 }
 0x183   :  { %563 = vrot.lane.b32.xlu1 %v4635_v16, %s4513_s10  ;;  %639 = vrot.lane.b32.xlu0 %v4643_v18, %s4513_s10 }
 0x186   :  { %v183_v20 = vpop.permute.xlu0 %182  ;;  %v260_v21 = vpop.permute.xlu1 %259 }
 0x187   :  { %715 = vrot.lane.b32.xlu1 %v4649_v19, %s4513_s10  ;;  %4002 = vmatpush3.xpose.msk.msra.mxu1 %vm184_vm2, %v183_v20 }
 0x188   :  { %4006 = vmatprep.subr.mxu1 %v4508_v10 }
 0x18a   :  { %4004 = vmatmul.mubr.msk.f32.vlgmr.msra.gmra.mrb[2].mxu1 %vm184_vm2, %v4605_v12 }
 0x18b   :  { %4007 = vmatpush3.xpose.msk.msra.mxu1 %vm184_vm2, %v260_v21  ;;  %4008 = vmatprep.mubr.msk.f32.mxu1 %vm4511_vm1, %v4508_v10 }
 0x18c   :  { %4016 = vmatprep.subr.mxu1 %v4508_v10 }
 0x18e   :  { %4009 = vmatmul.mubr.msk.f32.vlgmr.msra.gmra.mrb[4].mxu1 %vm184_vm2, %v4615_v13 }
 0x18f   :  { %4018 = vmatprep.mubr.msk.f32.mxu1 %vm4511_vm1, %v4508_v10 }
 0x1ed   :  { %v336_v22 = vpop.permute.xlu0 %335 }
 0x1ee   :  { %4012 = vmatpush3.xpose.msk.msra.mxu0 %vm184_vm2, %v336_v22 }
 0x1ef   :  { %4021 = vmatprep.subr.mxu0 %v4508_v10 }
 0x1f1   :  { %v412_v23 = vpop.permute.xlu1 %411  ;;  %4014 = vmatmul.mubr.msk.f32.vlgmr.msra.gmra.mrb[0].mxu0 %vm184_vm2, %v4631_v15  ;;  %v488_v24 = vpop.permute.xlu0 %487 }
 0x1f2   :  { %4017 = vmatpush3.xpose.msk.msra.mxu1 %vm184_vm2, %v412_v23  ;;  %4022 = vmatpush3.xpose.msk.msra.mxu0 %vm184_vm2, %v488_v24 }
 0x1f3   :  { %4023 = vmatprep.mubr.msk.f32.mxu0 %vm4511_vm1, %v4508_v10  ;;  %4026 = vmatprep.subr.mxu1 %v4508_v10 }
 0x1f4   :  { %4031 = vmatprep.subr.mxu0 %v4508_v10 }
 0x1f5   :  { %v564_v25 = vpop.permute.xlu1 %563  ;;  %4019 = vmatmul.mubr.msk.f32.vlgmr.msra.gmra.mrb[6].mxu1 %vm184_vm2, %v4637_v17  ;;  %4024 = vmatmul.mubr.msk.f32.vlgmr.msra.gmra.mrb[2].mxu0 %vm184_vm2, %v4629_v14  ;;  %v640_v26 = vpop.permute.xlu0 %639 }
 0x1f6   :  { %4027 = vmatpush3.xpose.msk.msra.mxu1 %vm184_vm2, %v564_v25  ;;  %4032 = vmatpush3.xpose.msk.msra.mxu0 %vm184_vm2, %v640_v26 }
 0x1f7   :  { %4028 = vmatprep.mubr.msk.f32.mxu1 %vm4511_vm1, %v4508_v10  ;;  %4033 = vmatprep.mubr.msk.f32.mxu0 %vm4511_vm1, %v4508_v10 }
 0x1f8   :  { %4036 = vmatprep.subr.mxu1 %v4508_v10  ;;  %4041 = vmatprep.subr.mxu0 %v4508_v10 }
 0x1f9   :  { %v716_v27 = vpop.permute.xlu1 %715  ;;  %4029 = vmatmul.mubr.msk.f32.vlgmr.msra.gmra.mrb[8].mxu1 %vm184_vm2, %v4635_v16  ;;  %4034 = vmatmul.mubr.msk.f32.vlgmr.msra.gmra.mrb[4].mxu0 %vm184_vm2, %v4643_v18 }
 0x1fa   :  { %4037 = vmatpush3.xpose.msk.msra.mxu1 %vm184_vm2, %v716_v27  ;;  %4038 = vmatprep.mubr.msk.f32.mxu1 %vm4511_vm1, %v4508_v10 }
 0x1fb   :  { %4046 = vmatprep.subr.mxu1 %v4508_v10  ;;  %4043 = vmatprep.mubr.msk.f32.mxu0 %vm4511_vm1, %v4508_v10 }
 0x1fd   :  { %4039 = vmatmul.mubr.msk.f32.vlgmr.msra.gmra.mrb[10].mxu1 %vm184_vm2, %v4649_v19 }
 0x1fe   :  { %4048 = vmatprep.mubr.msk.f32.mxu1 %vm4511_vm1, %v4508_v10 }
 0x25d   :  { %v255_v28 = vpop.f32.mrb[2].mxu1 }
 0x25e   :  { %v4005_v29 = vpop.f32.mrb[3].mxu1  ;;  %v791_v30 = vsel %vm184_vm2, %v255_v28, -inf }
 0x25f   :  { %792 = vmax.xlane.f32.xlu0 %v791_v30 }
 0x261   :  { %v331_v31 = vpop.f32.mrb[4].mxu1 }
 0x262   :  { %v4010_v32 = vpop.f32.mrb[5].mxu1  ;;  %v794_v33 = vsel %vm184_vm2, %v331_v31, -inf }
 0x263   :  { %795 = vmax.xlane.f32.xlu1 %v794_v33 }
 0x2c4   :  { %v407_v34 = vpop.f32.mrb[0].mxu0 }
 0x2c5   :  { %v4015_v35 = vpop.f32.mrb[1].mxu0  ;;  %v797_v36 = vsel %vm184_vm2, %v407_v34, -inf }
 0x2c6   :  { %798 = vmax.xlane.f32.xlu0 %v797_v36 }
 0x2c8   :  { %v483_v37 = vpop.f32.mrb[6].mxu1  ;;  %v559_v38 = vpop.f32.mrb[2].mxu0 }
 0x2c9   :  { %v4020_v39 = vpop.f32.mrb[7].mxu1  ;;  %v4025_v40 = vpop.f32.mrb[3].mxu0  ;;  %v800_v41 = vsel %vm184_vm2, %v483_v37, -inf  ;;  %v803_v42 = vsel %vm184_vm2, %v559_v38, -inf }
 0x2ca   :  { %801 = vmax.xlane.f32.xlu0 %v800_v41  ;;  %804 = vmax.xlane.f32.xlu1 %v803_v42 }
 0x2cc   :  { %v635_v43 = vpop.f32.mrb[8].mxu1  ;;  %v711_v44 = vpop.f32.mrb[4].mxu0 }
 0x2cd   :  { %v4030_v45 = vpop.f32.mrb[9].mxu1  ;;  %v4035_v46 = vpop.f32.mrb[5].mxu0  ;;  %v806_v47 = vsel %vm184_vm2, %v635_v43, -inf  ;;  %v809_v48 = vsel %vm184_vm2, %v711_v44, -inf }
 0x2ce   :  { %807 = vmax.xlane.f32.xlu0 %v806_v47  ;;  %810 = vmax.xlane.f32.xlu1 %v809_v48 }
 0x2d0   :  { %v787_v49 = vpop.f32.mrb[10].mxu1 }
 0x2d1   :  { %v4040_v50 = vpop.f32.mrb[11].mxu1  ;;  %v812_v51 = vsel %vm184_vm2, %v787_v49, -inf }
 0x2d2   :  { %813 = vmax.xlane.f32.xlu0 %v812_v51 }
 0x2df   :  { %903 = vrot.lane.b32.xlu1 %v4605_v12, %s4514_s11 }
 0x2e3   :  { %1055 = vrot.lane.b32.xlu1 %v4631_v15, %s4514_s11 }
 0x2e7   :  { %1131 = vrot.lane.b32.xlu1 %v4637_v17, %s4514_s11 }
 0x2e8   :  { %979 = vrot.lane.b32.xlu0 %v4615_v13, %s4514_s11 }
 0x2eb   :  { %1283 = vrot.lane.b32.xlu1 %v4635_v16, %s4514_s11 }
 0x2ec   :  { %1207 = vrot.lane.b32.xlu0 %v4629_v14, %s4514_s11  ;;  %v793_v54 = vpop.xlane.xlu0 %792 }
 0x2ed   :  { %v815_v55 = vsub.f32 %v255_v28, %v793_v54 }
 0x2ef   :  { %v823_v57 = vmul.f32 1.442695, %v815_v55 }
 0x2f0   :  { %v796_v52 = vpop.xlane.xlu1 %795 }
 0x2f1   :  { %v816_v53 = vsub.f32 %v331_v31, %v796_v52 }
 0x2f3   :  { %v825_v56 = vmul.f32 1.442695, %v816_v53 }
 0x2f5   :  { %4348 = vpow2.f32 %v825_v56 }
 0x2f6   :  { %4350 = vpow2.f32 %v823_v57 }
 0x2ff   :  { %v4721_v58 = vpop.eup %4348 }
 0x300   :  { %v842_v59 = vsel %vm184_vm2, %v4721_v58, 0.0  ;;  %v4725_v60 = vpop.eup %4350 }
 0x301   :  { %v839_v61 = vsel %vm184_vm2, %v4725_v60, 0.0 }
 0x30b   :  { %843 = vadd.xlane.f32.xlu0 %v842_v59 }
 0x30f   :  { %840 = vadd.xlane.f32.xlu1 %v839_v61 }
 0x353   :  { %v799_v62 = vpop.xlane.xlu0 %798 }
 0x354   :  { %v817_v63 = vsub.f32 %v407_v34, %v799_v62 }
 0x356   :  { %v827_v0 = vmul.f32 1.442695, %v817_v63 }
 0x357   :  { %v805_v1 = vpop.xlane.xlu1 %804  ;;  %v802_v2 = vpop.xlane.xlu0 %801 }
 0x358   :  { %4352 = vpow2.f32 %v827_v0  ;;  %v819_v3 = vsub.f32 %v559_v38, %v805_v1  ;;  %v818_v4 = vsub.f32 %v483_v37, %v802_v2 }
 0x35a   :  { %v831_v6 = vmul.f32 1.442695, %v819_v3  ;;  %v829_v8 = vmul.f32 1.442695, %v818_v4 }
 0x35b   :  { %v811_v9 = vpop.xlane.xlu1 %810  ;;  %v808_v11 = vpop.xlane.xlu0 %807 }
 0x35c   :  { %4354 = vpow2.f32 %v831_v6  ;;  %v821_v12 = vsub.f32 %v711_v44, %v811_v9  ;;  %v820_v13 = vsub.f32 %v635_v43, %v808_v11 }
 0x35d   :  { %4356 = vpow2.f32 %v829_v8 }
 0x35e   :  { %v835_v14 = vmul.f32 1.442695, %v821_v12  ;;  %v833_v15 = vmul.f32 1.442695, %v820_v13 }
 0x35f   :  { %v904_v16 = vpop.permute.xlu1 %903  ;;  %v814_v17 = vpop.xlane.xlu0 %813 }
 0x360   :  { %4358 = vpow2.f32 %v835_v14  ;;  %v822_v20 = vsub.f32 %v787_v49, %v814_v17  ;;  %4042 = vmatpush3.msra.mxu0 %v904_v16 }
 0x361   :  { %4360 = vpow2.f32 %v833_v15  ;;  %4051 = vmatprep.subr.mxu0 %v4508_v10 }
 0x362   :  { %v4730_v21 = vpop.eup %4352  ;;  %v837_v22 = vmul.f32 1.442695, %v822_v20 }
 0x363   :  { %v980_v23 = vpop.permute.xlu0 %979  ;;  %v845_v24 = vsel %vm184_vm2, %v4730_v21, 0.0  ;;  %v1056_v35 = vpop.permute.xlu1 %1055 }
 0x364   :  { %4362 = vpow2.f32 %v837_v22  ;;  %846 = vadd.xlane.f32.xlu1 %v845_v24  ;;  %4047 = vmatpush3.msra.mxu1 %v980_v23 }
 0x365   :  { %4056 = vmatprep.subr.mxu1 %v4508_v10 }
 0x366   :  { %v4735_v25 = vpop.eup %4354 }
 0x367   :  { %v4737_v26 = vpop.eup %4356  ;;  %v851_v27 = vsel %vm184_vm2, %v4735_v25, 0.0  ;;  %v1132_v36 = vpop.permute.xlu1 %1131 }
 0x368   :  { %852 = vadd.xlane.f32.xlu1 %v851_v27  ;;  %v848_v28 = vsel %vm184_vm2, %v4737_v26, 0.0  ;;  %v1208_v37 = vpop.permute.xlu0 %1207 }
 0x369   :  { %849 = vadd.xlane.f32.xlu0 %v848_v28 }
 0x36a   :  { %v4743_v29 = vpop.eup %4358 }
 0x36b   :  { %v4745_v30 = vpop.eup %4360  ;;  %v857_v31 = vsel %vm184_vm2, %v4743_v29, 0.0  ;;  %v4759_v38 = vpop.permute.xlu1 %1283 }
 0x36c   :  { %858 = vadd.xlane.f32.xlu1 %v857_v31  ;;  %v854_v32 = vsel %vm184_vm2, %v4745_v30, 0.0 }
 0x36d   :  { %855 = vadd.xlane.f32.xlu0 %v854_v32  ;;  %v58_v32 = vld [vmem:[%s5180_s2] sm:$0xff] }
 0x36e   :  { %v4751_v33 = vpop.eup %4362 }
 0x36f   :  { %v860_v34 = vsel %vm184_vm2, %v4751_v33, 0.0 }
 0x371   :  { %861 = vadd.xlane.f32.xlu0 %v860_v34  ;;  %v59_v34 = vld [vmem:[%s5180_s2 + $0x8] sm:$0xff] }
 0x37d   :  { %1435 = vrot.lane.b32.xlu1 %v4649_v19, %s4514_s11 }
 0x387   :  { %1359 = vrot.lane.b32.xlu0 %v4643_v18, %s4514_s11 }
 0x398   :  { %v844_v39 = vpop.xlane.xlu0 %843 }
 0x399   :  { %4364 = vrcp.f32 %v844_v39 }
 0x39c   :  { %v841_v40 = vpop.xlane.xlu1 %840 }
 0x39d   :  { %4366 = vrcp.f32 %v841_v40 }
 0x3a3   :  { %v4365_v41 = vpop.eup %4364 }
 0x3a4   :  { %v872_v42 = vmul.f32 %v4365_v41, %v844_v39 }
 0x3a6   :  { %v880_v43 = vsub.f32 2.0, %v872_v42 }
 0x3a7   :  { %v4367_v44 = vpop.eup %4366 }
 0x3a8   :  { %v888_v45 = vmul.f32 %v4365_v41, %v880_v43  ;;  %v871_v46 = vmul.f32 %v4367_v44, %v841_v40 }
 0x3aa   :  { %v896_v19 = vmul.f32 %v4721_v58, %v888_v45  ;;  %v879_v47 = vsub.f32 2.0, %v871_v46 }
 0x3ac   :  { %v887_v48 = vmul.f32 %v4367_v44, %v879_v47  ;;  %4049 = vmatmul.mubr.msk.f32.vlgmr.msra.gmra.mrb[12].mxu1 %vm184_vm2, %v896_v19 }
 0x3ad   :  { %4057 = vmatpush3.msra.mxu1 %v1132_v36  ;;  %4058 = vmatprep.mubr.msk.f32.mxu1 %vm4511_vm1, %v4508_v10  ;;  %v61_v36 = vld [vmem:[%s5180_s2 + $0x18] sm:$0xff] }
 0x3ae   :  { %v895_v18 = vmul.f32 %v4725_v60, %v887_v48  ;;  %4066 = vmatprep.subr.mxu1 %v4508_v10 }
 0x3b0   :  { %4044 = vmatmul.mubr.msk.f32.vlgmr.msra.gmra.mrb[6].mxu0 %vm184_vm2, %v895_v18 }
 0x3b1   :  { %4052 = vmatpush3.msra.mxu0 %v1056_v35  ;;  %4053 = vmatprep.mubr.msk.f32.mxu0 %vm4511_vm1, %v4508_v10  ;;  %v4262_v35 = vpack.c.bf16 %v59_v34, %v58_v32 }
 0x3b2   :  { %4061 = vmatprep.subr.mxu0 %v4508_v10 }
 0x3f1   :  { %v847_v49 = vpop.xlane.xlu1 %846 }
 0x3f2   :  { %4368 = vrcp.f32 %v847_v49 }
 0x3f5   :  { %v853_v50 = vpop.xlane.xlu1 %852 }
 0x3f6   :  { %4370 = vrcp.f32 %v853_v50  ;;  %v850_v51 = vpop.xlane.xlu0 %849 }
 0x3f7   :  { %4372 = vrcp.f32 %v850_v51 }
 0x3f9   :  { %v859_v52 = vpop.xlane.xlu1 %858 }
 0x3fa   :  { %4374 = vrcp.f32 %v859_v52  ;;  %v856_v53 = vpop.xlane.xlu0 %855 }
 0x3fb   :  { %4376 = vrcp.f32 %v856_v53 }
 0x3fc   :  { %v4369_v54 = vpop.eup %4368 }
 0x3fd   :  { %v873_v55 = vmul.f32 %v4369_v54, %v847_v49 }
 0x3fe   :  { %v862_v56 = vpop.xlane.xlu0 %861 }
 0x3ff   :  { %v881_v57 = vsub.f32 2.0, %v873_v55  ;;  %4378 = vrcp.f32 %v862_v56 }
 0x400   :  { %v4371_v58 = vpop.eup %4370 }
 0x401   :  { %v4373_v59 = vpop.eup %4372  ;;  %v889_v60 = vmul.f32 %v4369_v54, %v881_v57  ;;  %v875_v61 = vmul.f32 %v4371_v58, %v853_v50 }
 0x402   :  { %v874_v62 = vmul.f32 %v4373_v59, %v850_v51  ;;  %v1360_v17 = vpop.permute.xlu0 %1359 }
 0x403   :  { %v897_v63 = vmul.f32 %v4730_v21, %v889_v60  ;;  %v883_v0 = vsub.f32 2.0, %v875_v61  ;;  %v3795_v60 = vld [vmem:[#allocation5 + $0x1] ss:$0 sm:$0xff] }
 0x404   :  { %v4375_v1 = vpop.eup %4374  ;;  %v882_v2 = vsub.f32 2.0, %v874_v62 }
 0x405   :  { %v4377_v3 = vpop.eup %4376  ;;  %v891_v4 = vmul.f32 %v4371_v58, %v883_v0  ;;  %v877_v6 = vmul.f32 %v4375_v1, %v859_v52  ;;  %4054 = vmatmul.mubr.msk.f32.vlgmr.msra.gmra.mrb[8].mxu0 %vm184_vm2, %v897_v63 }
 0x406   :  { %v890_v8 = vmul.f32 %v4373_v59, %v882_v2  ;;  %v876_v9 = vmul.f32 %v4377_v3, %v856_v53  ;;  %4062 = vmatpush3.msra.mxu0 %v1208_v37  ;;  %4063 = vmatprep.mubr.msk.f32.mxu0 %vm4511_vm1, %v4508_v10 }
 0x407   :  { %v899_v11 = vmul.f32 %v4735_v25, %v891_v4  ;;  %v885_v12 = vsub.f32 2.0, %v877_v6  ;;  %4071 = vmatprep.subr.mxu0 %v4508_v10  ;;  %v1436_v25 = vpop.permute.xlu1 %1435 }
 0x408   :  { %v898_v13 = vmul.f32 %v4737_v26, %v890_v8  ;;  %v884_v14 = vsub.f32 2.0, %v876_v9 }
 0x409   :  { %v4379_v15 = vpop.eup %4378  ;;  %v893_v16 = vmul.f32 %v4375_v1, %v885_v12  ;;  %4064 = vmatmul.mubr.msk.f32.vlgmr.msra.gmra.mrb[10].mxu0 %vm184_vm2, %v899_v11 }
 0x40a   :  { %v892_v20 = vmul.f32 %v4377_v3, %v884_v14  ;;  %v878_v21 = vmul.f32 %v4379_v15, %v862_v56  ;;  %4059 = vmatmul.mubr.msk.f32.vlgmr.msra.gmra.mrb[14].mxu1 %vm184_vm2, %v898_v13  ;;  %4072 = vmatpush3.msra.mxu0 %v1360_v17  ;;  %v63_v17 = vld [vmem:[%s5181_s3 + $0x8] sm:$0xff] }
 0x40b   :  { %v901_v22 = vmul.f32 %v4743_v29, %v893_v16  ;;  %4067 = vmatpush3.msra.mxu1 %v4759_v38  ;;  %4068 = vmatprep.mubr.msk.f32.mxu1 %vm4511_vm1, %v4508_v10 }
 0x40c   :  { %v900_v23 = vmul.f32 %v4745_v30, %v892_v20  ;;  %v886_v24 = vsub.f32 2.0, %v878_v21  ;;  %4073 = vmatprep.mubr.msk.f32.mxu0 %vm4511_vm1, %v4508_v10  ;;  %4076 = vmatprep.subr.mxu1 %v4508_v10  ;;  %v64_v21 = vld [vmem:[%s5181_s3 + $0x10] sm:$0xff] }
 0x40d   :  { %4074 = vmatmul.mubr.msk.f32.vlgmr.msra.gmra.mrb[12].mxu0 %vm184_vm2, %v901_v22  ;;  %4263 = vmatprep.subr.bf16.mxu0 %v4262_v35  ;;  %v65_v22 = vld [vmem:[%s5181_s3 + $0x18] sm:$0xff] }
 0x40e   :  { %v894_v26 = vmul.f32 %v4379_v15, %v886_v24  ;;  %4069 = vmatmul.mubr.msk.f32.vlgmr.msra.gmra.mrb[16].mxu1 %vm184_vm2, %v900_v23  ;;  %4265 = vmatpush3.bf16.msra.mxu0 %v4262_v35  ;;  %v4274_v23 = vpack.c.bf16 %v65_v22, %v64_v21  ;;  %v66_v24 = vld [vmem:[%s5182_s4] sm:$0xff] }
 0x40f   :  { %4077 = vmatpush3.msra.mxu1 %v1436_v25  ;;  %4078 = vmatprep.mubr.msk.f32.mxu1 %vm4511_vm1, %v4508_v10  ;;  %v67_v25 = vld [vmem:[%s5182_s4 + $0x8] sm:$0xff] }
 0x410   :  { %v902_v27 = vmul.f32 %v4751_v33, %v894_v26  ;;  %v60_v33 = vld [vmem:[%s5180_s2 + $0x10] sm:$0xff] }
 0x411   :  { %v4266_v37 = vpack.c.bf16 %v61_v36, %v60_v33  ;;  %v68_v26 = vld [vmem:[%s5182_s4 + $0x10] sm:$0xff] }
 0x412   :  { %4079 = vmatmul.mubr.msk.f32.vlgmr.msra.gmra.mrb[18].mxu1 %vm184_vm2, %v902_v27  ;;  %v4278_v27 = vpack.c.bf16 %v67_v25, %v66_v24 }
 0x413   :  { %4267 = vmatprep.subr.bf16.mxu0 %v4266_v37 }
 0x414   :  { %4269 = vmatpush3.bf16.msra.mxu0 %v4266_v37 }
 0x415   :  { %4279 = vmatprep.subr.bf16.mxu0 %v4278_v27 }
 0x47f   :  { %v1051_v28 = vpop.f32.mrb[12].mxu1 }
 0x480   :  { %v4050_v29 = vpop.f32.mrb[13].mxu1 }
 0x483   :  { %v975_v30 = vpop.f32.mrb[6].mxu0 }
 0x484   :  { %v4045_v31 = vpop.f32.mrb[7].mxu0 }
 0x485   :  { %v71_v31 = vld [vmem:[%s5182_s4 + $0x28] sm:$0xff] }
 0x4d8   :  { %v1127_v38 = vpop.f32.mrb[8].mxu0 }
 0x4d9   :  { %v4055_v39 = vpop.f32.mrb[9].mxu0  ;;  %1513 = vrot.lane.b32.xlu0 %v1127_v38, %s4506_s8 }
 0x4dc   :  { %v1279_v40 = vpop.f32.mrb[10].mxu0 }
 0x4dd   :  { %v1203_v41 = vpop.f32.mrb[14].mxu1  ;;  %1521 = vrot.lane.b32.xlu0 %v1279_v40, %s4515_s20  ;;  %v4065_v42 = vpop.f32.mrb[11].mxu0  ;;  %v3798_v40 = vld [vmem:[#allocation5 + $0x4] ss:$0 sm:$0xff] }
 0x4de   :  { %1515 = vrot.lane.b32.xlu1 %v1203_v41, %s4506_s8  ;;  %v4060_v43 = vpop.f32.mrb[15].mxu1  ;;  %v3799_v42 = vld [vmem:[#allocation5 + $0x5] ss:$0 sm:$0xff] }
 0x4e0   :  { %v1431_v44 = vpop.f32.mrb[12].mxu0 }
 0x4e1   :  { %v1355_v45 = vpop.f32.mrb[16].mxu1  ;;  %1529 = vrot.lane.b32.xlu0 %v1431_v44, %s4516_s0  ;;  %v4075_v46 = vpop.f32.mrb[13].mxu0 }
 0x4e2   :  { %1523 = vrot.lane.b32.xlu1 %v1355_v45, %s4515_s20  ;;  %v4070_v19 = vpop.f32.mrb[17].mxu1 }
 0x4e5   :  { %v1507_v47 = vpop.f32.mrb[18].mxu1 }
 0x4e6   :  { %1531 = vrot.lane.b32.xlu1 %v1507_v47, %s4516_s0  ;;  %v4080_v48 = vpop.f32.mrb[19].mxu1 }
 0x4e7   :  { %v72_v48 = vld [vmem:[%s5182_s4 + $0x30] sm:$0xff] }
 0x54b   :  { %v1514_v18 = vpop.permute.xlu0 %1513 }
 0x54c   :  { %v1535_v51 = vsel %vm184_vm2, %v975_v30, %v1514_v18  ;;  %v70_v30 = vld [vmem:[%s5182_s4 + $0x20] sm:$0xff]  ;;  %v73_v18 = vld [vmem:[%s5182_s4 + $0x38] sm:$0xff] }
 0x54d   :  { %v4286_v32 = vpack.c.bf16 %v71_v31, %v70_v30 }
 0x54f   :  { %v1522_v49 = vpop.permute.xlu0 %1521 }
 0x550   :  { %v1516_v50 = vpop.permute.xlu1 %1515  ;;  %v1538_v52 = vsel %vm1537_vm3, %v1535_v51, %v1522_v49  ;;  %v4290_v49 = vpack.c.bf16 %v73_v18, %v72_v48 }
 0x551   :  { %v1536_v56 = vsel %vm184_vm2, %v1051_v28, %v1516_v50  ;;  %v69_v28 = vld [vmem:[%s5182_s4 + $0x18] sm:$0xff]  ;;  %v3800_v50 = vld [vmem:[#allocation5 + $0x2] ss:$0 sm:$0xff] }
 0x552   :  { %v4282_v29 = vpack.c.bf16 %v69_v28, %v68_v26  ;;  %v3806_v28 = vld [vmem:[#allocation5 + $0x6] ss:$0 sm:$0xff] }
 0x553   :  { %v1530_v53 = vpop.permute.xlu0 %1529 }
 0x554   :  { %v1524_v54 = vpop.permute.xlu1 %1523  ;;  %v1541_v55 = vsel %vm1540_vm4, %v1538_v52, %v1530_v53 }
 0x555   :  { %4089 = vmatprep.mubr.msk.f32.mxu0 %vm86_vm0, %v1541_v55  ;;  %v1539_v57 = vsel %vm1537_vm3, %v1536_v56, %v1524_v54 }
 0x558   :  { %v1532_v58 = vpop.permute.xlu1 %1531 }
 0x559   :  { %v1542_v59 = vsel %vm1540_vm4, %v1539_v57, %v1532_v58  ;;  %v3803_v57 = vld [vmem:[#allocation5 + $0x3] ss:$0 sm:$0xff] }
 0x55a   :  { %4090 = vmatmul.mubr.msk.f32.vlgmr.msra.gmra.mrb[14].mxu0 %vm86_vm0, %v1542_v59 }
 0x55b   :  { %4281 = vmatpush3.bf16.msra.mxu0 %v4278_v27 }
 0x55c   :  { %4283 = vmatprep.subr.bf16.mxu0 %v4282_v29 }
 0x55f   :  { %4285 = vmatpush3.bf16.msra.mxu0 %v4282_v29 }
 0x560   :  { %4287 = vmatprep.subr.bf16.mxu0 %v4286_v32 }
 0x563   :  { %4289 = vmatpush3.bf16.msra.mxu0 %v4286_v32  ;;  %v3807_v32 = vld [vmem:[#allocation5 + $0x7] ss:$0 sm:$0xff] }
 0x564   :  { %4291 = vmatprep.subr.bf16.mxu0 %v4290_v49 }
 0x567   :  { %4293 = vmatpush3.bf16.msra.mxu0 %v4290_v49 }
 0x568   :  { %4143 = vmatprep.subr.mxu0 %v4508_v10 }
 0x62d   :  { %v4091_v61 = vpop.f32.mrb[14].mxu0 }
 0x62e   :  { %v1625_v62 = vadd.f32 %v4091_v61, %v3795_v60  ;;  %v1619_v63 = vpop.f32.mrb[15].mxu0 }
 0x62f   :  { %v1620_v0 = vadd.f32 %v3795_v60, %v1619_v63 }
 0x630   :  { %v1629_v1 = vadd.f32 %v1625_v62, %v4599_v7 }
 0x631   :  { %v1628_v2 = vadd.f32 %v1620_v0, %v4595_v5  ;;  %v62_v5 = vld [vmem:[%s5181_s3] sm:$0xff] }
 0x632   :  { %v1633_v3 = vsel %vm86_vm0, %v1629_v1, 0.0  ;;  %v4270_v20 = vpack.c.bf16 %v63_v17, %v62_v5  ;;  %v3810_v5 = vld [vmem:[%s5179_s1 + $0x30] sm:$0xff]  ;;  %v3811_v17 = vld [vmem:[%s5179_s1 + $0x38] sm:$0xff] }
 0x633   :  { %1634 = vadd.xlane.f32.xlu1 %v1633_v3  ;;  %v1630_v4 = vsel %vm86_vm0, %v1628_v2, 0.0 }
 0x634   :  { %1631 = vadd.xlane.f32.xlu0 %v1630_v4  ;;  %4271 = vmatprep.subr.bf16.mxu1 %v4270_v20 }
 0x635   :  { %4273 = vmatpush3.bf16.msra.mxu1 %v4270_v20  ;;  %v4298_v20 = vpack.c.bf16 %v3811_v17, %v3810_v5 }
 0x636   :  { %4275 = vmatprep.subr.bf16.mxu1 %v4274_v23 }
 0x639   :  { %4277 = vmatpush3.bf16.msra.mxu1 %v4274_v23 }
 0x6c0   :  { %v1635_v6 = vpop.xlane.xlu1 %1634 }
 0x6c1   :  { %v1638_v8 = vmul.f32 0.03125, %v1635_v6  ;;  %v1632_v9 = vpop.xlane.xlu0 %1631 }
 0x6c2   :  { %v1637_v11 = vmul.f32 0.03125, %v1632_v9 }
 0x6c3   :  { %v1640_v12 = vsub.f32 %v1629_v1, %v1638_v8 }
 0x6c4   :  { %v1639_v13 = vsub.f32 %v1628_v2, %v1637_v11 }
 0x6c5   :  { %v1642_v16 = vmul.f32 %v1640_v12, %v1640_v12 }
 0x6c6   :  { %v1641_v14 = vmul.f32 %v1639_v13, %v1639_v13 }
 0x6c7   :  { %v1646_v7 = vsel %vm86_vm0, %v1642_v16, 0.0  ;;  %v3809_v16 = vld [vmem:[%s5179_s1 + $0x28] sm:$0xff] }
 0x6c8   :  { %v1643_v15 = vsel %vm86_vm0, %v1641_v14, 0.0 }
 0x6c9   :  { %1644 = vadd.xlane.f32.xlu0 %v1643_v15  ;;  %v3808_v15 = vld [vmem:[%s5179_s1 + $0x20] sm:$0xff] }
 0x6cd   :  { %1647 = vadd.xlane.f32.xlu0 %v1646_v7  ;;  %v4294_v7 = vpack.c.bf16 %v3809_v16, %v3808_v15 }
 0x6cf   :  { %4295 = vmatprep.subr.bf16.mxu1 %v4294_v7 }
 0x756   :  { %v1645_v34 = vpop.xlane.xlu0 %1644 }
 0x757   :  { %v1649_v35 = vmul.f32 0.03125, %v1645_v34 }
 0x759   :  { %v1651_v33 = vadd.f32 1e-05, %v1649_v35 }
 0x75a   :  { %v1648_v36 = vpop.xlane.xlu0 %1647 }
 0x75b   :  { %4380 = vrsqrt.f32 %v1651_v33  ;;  %v1650_v37 = vmul.f32 0.03125, %v1648_v36 }
 0x75d   :  { %v1652_v38 = vadd.f32 1e-05, %v1650_v37  ;;  %v3828_v37 = vld [vmem:[#allocation5 + $0x8] ss:$0 sm:$0xff] }
 0x75f   :  { %4382 = vrsqrt.f32 %v1652_v38 }
 0x765   :  { %v4381_v39 = vpop.eup %4380 }
 0x766   :  { %v1655_v41 = vmul.f32 %v4381_v39, %v1639_v13 }
 0x768   :  { %v1661_v43 = vmul.f32 %v3798_v40, %v1655_v41 }
 0x769   :  { %v4383_v44 = vpop.eup %4382 }
 0x76a   :  { %v1656_v45 = vmul.f32 %v4383_v44, %v1640_v12  ;;  %v1667_v46 = vadd.f32 %v3799_v42, %v1661_v43 }
 0x76c   :  { %v1662_v19 = vmul.f32 %v3798_v40, %v1656_v45  ;;  %4100 = vmatprep.mubr.msk.f32.mxu1 %vm86_vm0, %v1667_v46 }
 0x76e   :  { %v1668_v47 = vadd.f32 %v3799_v42, %v1662_v19 }
 0x770   :  { %4101 = vmatmul.mubr.msk.f32.vlgmr.msra.gmra.mrb[20].mxu1 %vm86_vm0, %v1668_v47 }
 0x771   :  { %4297 = vmatpush3.bf16.msra.mxu1 %v4294_v7 }
 0x772   :  { %4299 = vmatprep.subr.bf16.mxu1 %v4298_v20 }
 0x775   :  { %4301 = vmatpush3.bf16.msra.mxu1 %v4298_v20 }
 0x776   :  { %4133 = vmatprep.subr.mxu1 %v4508_v10 }
 0x843   :  { %v4102_v51 = vpop.f32.mrb[20].mxu1 }
 0x844   :  { %v1751_v52 = vadd.f32 %v4102_v51, %v3800_v50  ;;  %v1745_v53 = vpop.f32.mrb[21].mxu1 }
 0x845   :  { %v1746_v54 = vadd.f32 %v3800_v50, %v1745_v53 }
 0x846   :  { %v1755_v56 = vmax.f32 %v1751_v52, 0.0 }
 0x847   :  { %v1754_v55 = vmax.f32 %v1746_v54, 0.0 }
 0x849   :  { %4119 = vmatprep.mubr.msk.f32.mxu0 %vm1760_vm5, %v1754_v55 }
 0x84a   :  { %4120 = vmatmul.mubr.msk.f32.vlgmr.msra.gmra.mrb[16].mxu0 %vm1760_vm5, %v1755_v56 }
 0x84b   :  { %4145 = vmatprep.mubr.msk.f32.mxu0 %vm4511_vm1, %v4508_v10 }
 0x91d   :  { %v4121_v58 = vpop.f32.mrb[16].mxu0 }
 0x91e   :  { %v1839_v59 = vadd.f32 %v4121_v58, %v3803_v57  ;;  %v1833_v60 = vpop.f32.mrb[17].mxu0 }
 0x91f   :  { %v1834_v61 = vadd.f32 %v3803_v57, %v1833_v60 }
 0x920   :  { %v1843_v62 = vadd.f32 %v1839_v59, %v1668_v47 }
 0x921   :  { %v1842_v63 = vadd.f32 %v1834_v61, %v1667_v46 }
 0x922   :  { %v1847_v0 = vsel %vm86_vm0, %v1843_v62, 0.0 }
 0x923   :  { %1848 = vadd.xlane.f32.xlu0 %v1847_v0  ;;  %v1844_v1 = vsel %vm86_vm0, %v1842_v63, 0.0 }
 0x924   :  { %1845 = vadd.xlane.f32.xlu1 %v1844_v1 }
 0x9b0   :  { %v1849_v2 = vpop.xlane.xlu0 %1848 }
 0x9b1   :  { %v1851_v3 = vmul.f32 0.03125, %v1849_v2  ;;  %v1846_v4 = vpop.xlane.xlu1 %1845 }
 0x9b2   :  { %v1850_v6 = vmul.f32 0.03125, %v1846_v4 }
 0x9b3   :  { %v1853_v8 = vsub.f32 %v1843_v62, %v1851_v3 }
 0x9b4   :  { %v1852_v9 = vsub.f32 %v1842_v63, %v1850_v6 }
 0x9b5   :  { %v1855_v11 = vmul.f32 %v1853_v8, %v1853_v8 }
 0x9b6   :  { %v1854_v12 = vmul.f32 %v1852_v9, %v1852_v9 }
 0x9b7   :  { %v1859_v13 = vsel %vm86_vm0, %v1855_v11, 0.0 }
 0x9b8   :  { %1860 = vadd.xlane.f32.xlu0 %v1859_v13  ;;  %v1856_v14 = vsel %vm86_vm0, %v1854_v12, 0.0 }
 0x9b9   :  { %1857 = vadd.xlane.f32.xlu1 %v1856_v14 }
 0xa45   :  { %v1861_v21 = vpop.xlane.xlu0 %1860 }
 0xa46   :  { %v1863_v22 = vmul.f32 0.03125, %v1861_v21  ;;  %v1858_v23 = vpop.xlane.xlu1 %1857 }
 0xa47   :  { %v1862_v24 = vmul.f32 0.03125, %v1858_v23 }
 0xa48   :  { %v1865_v25 = vadd.f32 1e-05, %v1863_v22 }
 0xa49   :  { %v1864_v26 = vadd.f32 1e-05, %v1862_v24 }
 0xa4a   :  { %4384 = vrsqrt.f32 %v1865_v25 }
 0xa4b   :  { %4386 = vrsqrt.f32 %v1864_v26 }
 0xa54   :  { %v4385_v27 = vpop.eup %4384 }
 0xa55   :  { %v4387_v29 = vpop.eup %4386  ;;  %v1869_v30 = vmul.f32 %v4385_v27, %v1853_v8 }
 0xa56   :  { %v1868_v31 = vmul.f32 %v4387_v29, %v1852_v9 }
 0xa57   :  { %v1875_v34 = vmul.f32 %v3806_v28, %v1869_v30 }
 0xa58   :  { %v1874_v35 = vmul.f32 %v3806_v28, %v1868_v31 }
 0xa59   :  { %v4888_v36 = vadd.f32 %v3807_v32, %v1875_v34 }
 0xa5a   :  { %v4886_v33 = vadd.f32 %v3807_v32, %v1874_v35 }
 0xa5c   :  { %4130 = vmatprep.mubr.msk.f32.mxu1 %vm86_vm0, %v4886_v33 }
 0xa5d   :  { %4131 = vmatmul.mubr.msk.f32.vlgmr.msra.gmra.mrb[22].mxu1 %vm86_vm0, %v4888_v36 }
 0xa5e   :  { %4135 = vmatprep.mubr.msk.f32.mxu1 %vm4511_vm1, %v4508_v10 }
 0xb30   :  { %v4132_v38 = vpop.f32.mrb[22].mxu1 }
 0xb31   :  { %v4896_v39 = vadd.f32 %v4132_v38, %v3828_v37  ;;  %v1990_v40 = vpop.f32.mrb[23].mxu1 }
 0xb32   :  { %v4898_v41 = vadd.f32 %v3828_v37, %v1990_v40 }
 0xb33   :  { %2003 = vrot.lane.b32.xlu0 %v4896_v39, %s4510_s30 }
 0xb34   :  { %2001 = vrot.lane.b32.xlu1 %v4898_v41, %s4510_s30 }
 0xb37   :  { %2009 = vrot.lane.b32.xlu0 %v4898_v41, %s4512_s9 }
 0xb38   :  { %2005 = vrot.lane.b32.xlu1 %v4898_v41, %s4509_s29 }
 0xb3b   :  { %2013 = vrot.lane.b32.xlu0 %v4898_v41, %s4513_s10 }
 0xb3c   :  { %2007 = vrot.lane.b32.xlu1 %v4896_v39, %s4509_s29 }
 0xb40   :  { %2011 = vrot.lane.b32.xlu1 %v4896_v39, %s4512_s9 }
 0xb44   :  { %2089 = vrot.lane.b32.xlu1 %v4896_v39, %s4513_s10 }
 0xba5   :  { %v4916_v42 = vpop.permute.xlu0 %2003 }
 0xba6   :  { %2241 = vrot.lane.b32.xlu1 %v4916_v42, %s4513_s10  ;;  %v4920_v43 = vpop.permute.xlu1 %2001 }
 0xba7   :  { %2165 = vrot.lane.b32.xlu0 %v4920_v43, %s4513_s10 }
 0xba9   :  { %v4924_v44 = vpop.permute.xlu0 %2009 }
 0xbaa   :  { %v4926_v45 = vpop.permute.xlu1 %2005 }
 0xbab   :  { %2317 = vrot.lane.b32.xlu0 %v4926_v45, %s4513_s10 }
 0xbad   :  { %v2014_v46 = vpop.permute.xlu0 %2013 }
 0xbae   :  { %4134 = vmatpush3.xpose.msk.msra.mxu1 %vm184_vm2, %v2014_v46  ;;  %v4931_v19 = vpop.permute.xlu1 %2007 }
 0xbaf   :  { %2469 = vrot.lane.b32.xlu0 %v4924_v44, %s4513_s10  ;;  %2393 = vrot.lane.b32.xlu1 %v4931_v19, %s4513_s10 }
 0xbb0   :  { %4138 = vmatprep.subr.mxu1 %v4508_v10 }
 0xbb1   :  { %4136 = vmatmul.mubr.msk.f32.vlgmr.msra.gmra.mrb[24].mxu1 %vm184_vm2, %v4898_v41 }
 0xbb2   :  { %v4940_v47 = vpop.permute.xlu1 %2011  ;;  %4140 = vmatprep.mubr.msk.f32.mxu1 %vm4511_vm1, %v4508_v10 }
 0xbb3   :  { %2545 = vrot.lane.b32.xlu1 %v4940_v47, %s4513_s10 }
 0xbb6   :  { %v2090_v48 = vpop.permute.xlu1 %2089 }
 0xbb7   :  { %4139 = vmatpush3.xpose.msk.msra.mxu1 %vm184_vm2, %v2090_v48 }
 0xbb8   :  { %4148 = vmatprep.subr.mxu1 %v4508_v10 }
 0xbba   :  { %4141 = vmatmul.mubr.msk.f32.vlgmr.msra.gmra.mrb[26].mxu1 %vm184_vm2, %v4896_v39 }
 0xbbb   :  { %4150 = vmatprep.mubr.msk.f32.mxu1 %vm4511_vm1, %v4508_v10 }
 0xc18   :  { %v2242_v18 = vpop.permute.xlu1 %2241 }
 0xc19   :  { %v2166_v49 = vpop.permute.xlu0 %2165  ;;  %4149 = vmatpush3.xpose.msk.msra.mxu1 %vm184_vm2, %v2242_v18 }
 0xc1a   :  { %4144 = vmatpush3.xpose.msk.msra.mxu0 %vm184_vm2, %v2166_v49  ;;  %4158 = vmatprep.subr.mxu1 %v4508_v10 }
 0xc1b   :  { %4153 = vmatprep.subr.mxu0 %v4508_v10 }
 0xc1c   :  { %4151 = vmatmul.mubr.msk.f32.vlgmr.msra.gmra.mrb[28].mxu1 %vm184_vm2, %v4916_v42 }
 0xc1d   :  { %4146 = vmatmul.mubr.msk.f32.vlgmr.msra.gmra.mrb[18].mxu0 %vm184_vm2, %v4920_v43  ;;  %v2318_v50 = vpop.permute.xlu0 %2317  ;;  %4160 = vmatprep.mubr.msk.f32.mxu1 %vm4511_vm1, %v4508_v10 }
 0xc1e   :  { %4154 = vmatpush3.xpose.msk.msra.mxu0 %vm184_vm2, %v2318_v50  ;;  %4155 = vmatprep.mubr.msk.f32.mxu0 %vm4511_vm1, %v4508_v10 }
 0xc1f   :  { %4163 = vmatprep.subr.mxu0 %v4508_v10 }
 0xc21   :  { %4156 = vmatmul.mubr.msk.f32.vlgmr.msra.gmra.mrb[20].mxu0 %vm184_vm2, %v4926_v45  ;;  %v2470_v51 = vpop.permute.xlu0 %2469  ;;  %v2394_v52 = vpop.permute.xlu1 %2393 }
 0xc22   :  { %4159 = vmatpush3.xpose.msk.msra.mxu1 %vm184_vm2, %v2394_v52  ;;  %4164 = vmatpush3.xpose.msk.msra.mxu0 %vm184_vm2, %v2470_v51 }
 0xc23   :  { %4165 = vmatprep.mubr.msk.f32.mxu0 %vm4511_vm1, %v4508_v10  ;;  %4168 = vmatprep.subr.mxu1 %v4508_v10 }
 0xc24   :  { %4173 = vmatprep.subr.mxu0 %v4508_v10 }
 0xc25   :  { %4161 = vmatmul.mubr.msk.f32.vlgmr.msra.gmra.mrb[30].mxu1 %vm184_vm2, %v4931_v19  ;;  %4166 = vmatmul.mubr.msk.f32.vlgmr.msra.gmra.mrb[22].mxu0 %vm184_vm2, %v4924_v44  ;;  %v2546_v53 = vpop.permute.xlu1 %2545 }
 0xc26   :  { %4169 = vmatpush3.xpose.msk.msra.mxu1 %vm184_vm2, %v2546_v53  ;;  %4170 = vmatprep.mubr.msk.f32.mxu1 %vm4511_vm1, %v4508_v10 }
 0xc27   :  { %4178 = vmatprep.subr.mxu1 %v4508_v10  ;;  %4175 = vmatprep.mubr.msk.f32.mxu0 %vm4511_vm1, %v4508_v10 }
 0xc29   :  { %4171 = vmatmul.mubr.msk.f32.vlgmr.msra.gmra.mrb[32].mxu1 %vm184_vm2, %v4940_v47 }
 0xc2a   :  { %4180 = vmatprep.mubr.msk.f32.mxu1 %vm4511_vm1, %v4508_v10 }
 0xc84   :  { %v2085_v54 = vpop.f32.mrb[24].mxu1 }
 0xc85   :  { %v4137_v55 = vpop.f32.mrb[25].mxu1  ;;  %v2621_v56 = vsel %vm184_vm2, %v2085_v54, -inf }
 0xc86   :  { %2622 = vmax.xlane.f32.xlu0 %v2621_v56 }
 0xc8d   :  { %v2161_v57 = vpop.f32.mrb[26].mxu1 }
 0xc8e   :  { %v4142_v58 = vpop.f32.mrb[27].mxu1  ;;  %v2624_v59 = vsel %vm184_vm2, %v2161_v57, -inf }
 0xc8f   :  { %2625 = vmax.xlane.f32.xlu1 %v2624_v59 }
 0xcef   :  { %v2313_v60 = vpop.f32.mrb[28].mxu1 }
 0xcf0   :  { %v2237_v61 = vpop.f32.mrb[18].mxu0  ;;  %v4152_v62 = vpop.f32.mrb[29].mxu1  ;;  %v2630_v4 = vsel %vm184_vm2, %v2313_v60, -inf }
 0xcf1   :  { %v4147_v63 = vpop.f32.mrb[19].mxu0  ;;  %v2627_v0 = vsel %vm184_vm2, %v2237_v61, -inf }
 0xcf2   :  { %2628 = vmax.xlane.f32.xlu0 %v2627_v0 }
 0xcf4   :  { %v2389_v1 = vpop.f32.mrb[20].mxu0 }
 0xcf5   :  { %v4157_v2 = vpop.f32.mrb[21].mxu0  ;;  %v2633_v3 = vsel %vm184_vm2, %v2389_v1, -inf }
 0xcf6   :  { %2634 = vmax.xlane.f32.xlu1 %v2633_v3  ;;  %2631 = vmax.xlane.f32.xlu0 %v2630_v4 }
 0xcf8   :  { %v2465_v6 = vpop.f32.mrb[30].mxu1  ;;  %v2541_v8 = vpop.f32.mrb[22].mxu0 }
 0xcf9   :  { %v4162_v9 = vpop.f32.mrb[31].mxu1  ;;  %v4167_v11 = vpop.f32.mrb[23].mxu0  ;;  %v2639_v12 = vsel %vm184_vm2, %v2541_v8, -inf  ;;  %v2636_v13 = vsel %vm184_vm2, %v2465_v6, -inf }
 0xcfa   :  { %2640 = vmax.xlane.f32.xlu1 %v2639_v12  ;;  %2637 = vmax.xlane.f32.xlu0 %v2636_v13 }
 0xcfc   :  { %v2617_v14 = vpop.f32.mrb[32].mxu1 }
 0xcfd   :  { %v4172_v15 = vpop.f32.mrb[33].mxu1  ;;  %v2642_v16 = vsel %vm184_vm2, %v2617_v14, -inf }
 0xcfe   :  { %2643 = vmax.xlane.f32.xlu0 %v2642_v16 }
 0xd0b   :  { %2733 = vrot.lane.b32.xlu1 %v4898_v41, %s4514_s11 }
 0xd0f   :  { %2885 = vrot.lane.b32.xlu1 %v4920_v43, %s4514_s11 }
 0xd13   :  { %2961 = vrot.lane.b32.xlu1 %v4916_v42, %s4514_s11  ;;  %v2623_v17 = vpop.xlane.xlu0 %2622 }
 0xd14   :  { %2809 = vrot.lane.b32.xlu0 %v4896_v39, %s4514_s11  ;;  %v2645_v20 = vsub.f32 %v2085_v54, %v2623_v17 }
 0xd16   :  { %v2653_v22 = vmul.f32 1.442695, %v2645_v20 }
 0xd17   :  { %3113 = vrot.lane.b32.xlu1 %v4931_v19, %s4514_s11 }
 0xd18   :  { %3037 = vrot.lane.b32.xlu0 %v4926_v45, %s4514_s11 }
 0xd1c   :  { %v2626_v7 = vpop.xlane.xlu1 %2625 }
 0xd1d   :  { %v2646_v5 = vsub.f32 %v2161_v57, %v2626_v7 }
 0xd1f   :  { %v2655_v21 = vmul.f32 1.442695, %v2646_v5 }
 0xd21   :  { %4388 = vpow2.f32 %v2655_v21 }
 0xd22   :  { %4390 = vpow2.f32 %v2653_v22 }
 0xd2b   :  { %v5008_v23 = vpop.eup %4388 }
 0xd2c   :  { %v2672_v24 = vsel %vm184_vm2, %v5008_v23, 0.0  ;;  %v5012_v25 = vpop.eup %4390 }
 0xd2d   :  { %v2669_v26 = vsel %vm184_vm2, %v5012_v25, 0.0 }
 0xd37   :  { %2673 = vadd.xlane.f32.xlu0 %v2672_v24 }
 0xd3b   :  { %2670 = vadd.xlane.f32.xlu1 %v2669_v26 }
 0xd7f   :  { %v2629_v27 = vpop.xlane.xlu0 %2628 }
 0xd80   :  { %v2647_v28 = vsub.f32 %v2237_v61, %v2629_v27 }
 0xd82   :  { %v2657_v29 = vmul.f32 1.442695, %v2647_v28 }
 0xd83   :  { %v2632_v30 = vpop.xlane.xlu0 %2631  ;;  %v2635_v31 = vpop.xlane.xlu1 %2634 }
 0xd84   :  { %4392 = vpow2.f32 %v2657_v29  ;;  %v2648_v32 = vsub.f32 %v2313_v60, %v2632_v30  ;;  %v2649_v34 = vsub.f32 %v2389_v1, %v2635_v31 }
 0xd86   :  { %v2659_v35 = vmul.f32 1.442695, %v2648_v32  ;;  %v2661_v37 = vmul.f32 1.442695, %v2649_v34 }
 0xd87   :  { %v2638_v38 = vpop.xlane.xlu0 %2637  ;;  %v2641_v39 = vpop.xlane.xlu1 %2640 }
 0xd88   :  { %4394 = vpow2.f32 %v2659_v35  ;;  %v2650_v40 = vsub.f32 %v2465_v6, %v2638_v38  ;;  %v2651_v41 = vsub.f32 %v2541_v8, %v2641_v39 }
 0xd89   :  { %4396 = vpow2.f32 %v2661_v37 }
 0xd8a   :  { %v2663_v42 = vmul.f32 1.442695, %v2650_v40  ;;  %v2665_v43 = vmul.f32 1.442695, %v2651_v41 }
 0xd8b   :  { %v2644_v45 = vpop.xlane.xlu0 %2643  ;;  %v2734_v46 = vpop.permute.xlu1 %2733 }
 0xd8c   :  { %4398 = vpow2.f32 %v2663_v42  ;;  %v2652_v19 = vsub.f32 %v2617_v14, %v2644_v45  ;;  %4174 = vmatpush3.msra.mxu0 %v2734_v46 }
 0xd8d   :  { %4400 = vpow2.f32 %v2665_v43  ;;  %4183 = vmatprep.subr.mxu0 %v4508_v10 }
 0xd8e   :  { %v5017_v48 = vpop.eup %4392  ;;  %v2667_v18 = vmul.f32 1.442695, %v2652_v19 }
 0xd8f   :  { %v2810_v49 = vpop.permute.xlu0 %2809  ;;  %v2675_v50 = vsel %vm184_vm2, %v5017_v48, 0.0  ;;  %v2886_v61 = vpop.permute.xlu1 %2885 }
 0xd90   :  { %4402 = vpow2.f32 %v2667_v18  ;;  %2676 = vadd.xlane.f32.xlu1 %v2675_v50  ;;  %4179 = vmatpush3.msra.mxu1 %v2810_v49 }
 0xd91   :  { %4188 = vmatprep.subr.mxu1 %v4508_v10 }
 0xd92   :  { %v5022_v51 = vpop.eup %4394 }
 0xd93   :  { %v5024_v52 = vpop.eup %4396  ;;  %v2678_v53 = vsel %vm184_vm2, %v5022_v51, 0.0  ;;  %v2962_v62 = vpop.permute.xlu1 %2961 }
 0xd94   :  { %2679 = vadd.xlane.f32.xlu0 %v2678_v53  ;;  %v2681_v54 = vsel %vm184_vm2, %v5024_v52, 0.0  ;;  %v3038_v63 = vpop.permute.xlu0 %3037 }
 0xd95   :  { %2682 = vadd.xlane.f32.xlu1 %v2681_v54 }
 0xd96   :  { %v5030_v55 = vpop.eup %4398 }
 0xd97   :  { %v5032_v56 = vpop.eup %4400  ;;  %v2684_v57 = vsel %vm184_vm2, %v5030_v55, 0.0  ;;  %v5046_v0 = vpop.permute.xlu1 %3113 }
 0xd98   :  { %2685 = vadd.xlane.f32.xlu0 %v2684_v57  ;;  %v2687_v58 = vsel %vm184_vm2, %v5032_v56, 0.0 }
 0xd99   :  { %2688 = vadd.xlane.f32.xlu1 %v2687_v58  ;;  %v3812_v58 = vld [vmem:[%s5180_s2 + $0x20] sm:$0xff] }
 0xd9a   :  { %v5038_v59 = vpop.eup %4402 }
 0xd9b   :  { %v2690_v60 = vsel %vm184_vm2, %v5038_v59, 0.0 }
 0xd9c   :  { %2691 = vadd.xlane.f32.xlu0 %v2690_v60  ;;  %v3813_v60 = vld [vmem:[%s5180_s2 + $0x28] sm:$0xff] }
 0xdaa   :  { %3265 = vrot.lane.b32.xlu1 %v4940_v47, %s4514_s11 }
 0xdb2   :  { %3189 = vrot.lane.b32.xlu0 %v4924_v44, %s4514_s11 }
 0xdc4   :  { %v2674_v1 = vpop.xlane.xlu0 %2673 }
 0xdc5   :  { %4404 = vrcp.f32 %v2674_v1 }
 0xdc8   :  { %v2671_v2 = vpop.xlane.xlu1 %2670 }
 0xdc9   :  { %4406 = vrcp.f32 %v2671_v2 }
 0xdcf   :  { %v4405_v3 = vpop.eup %4404 }
 0xdd0   :  { %v2702_v4 = vmul.f32 %v4405_v3, %v2674_v1 }
 0xdd2   :  { %v2710_v6 = vsub.f32 2.0, %v2702_v4 }
 0xdd3   :  { %v4407_v8 = vpop.eup %4406 }
 0xdd4   :  { %v2718_v9 = vmul.f32 %v4405_v3, %v2710_v6  ;;  %v2701_v11 = vmul.f32 %v4407_v8, %v2671_v2 }
 0xdd6   :  { %v2726_v47 = vmul.f32 %v5008_v23, %v2718_v9  ;;  %v2709_v12 = vsub.f32 2.0, %v2701_v11 }
 0xdd8   :  { %v2717_v13 = vmul.f32 %v4407_v8, %v2709_v12  ;;  %4181 = vmatmul.mubr.msk.f32.vlgmr.msra.gmra.mrb[34].mxu1 %vm184_vm2, %v2726_v47 }
 0xdd9   :  { %4189 = vmatpush3.msra.mxu1 %v2962_v62  ;;  %4190 = vmatprep.mubr.msk.f32.mxu1 %vm4511_vm1, %v4508_v10 }
 0xdda   :  { %v2725_v44 = vmul.f32 %v5012_v25, %v2717_v13  ;;  %4198 = vmatprep.subr.mxu1 %v4508_v10 }
 0xddc   :  { %4176 = vmatmul.mubr.msk.f32.vlgmr.msra.gmra.mrb[24].mxu0 %vm184_vm2, %v2725_v44 }
 0xddd   :  { %4184 = vmatpush3.msra.mxu0 %v2886_v61  ;;  %4185 = vmatprep.mubr.msk.f32.mxu0 %vm4511_vm1, %v4508_v10  ;;  %v4302_v61 = vpack.c.bf16 %v3813_v60, %v3812_v58 }
 0xdde   :  { %4193 = vmatprep.subr.mxu0 %v4508_v10 }
 0xe1d   :  { %v2677_v14 = vpop.xlane.xlu1 %2676 }
 0xe1e   :  { %4408 = vrcp.f32 %v2677_v14 }
 0xe21   :  { %v2680_v15 = vpop.xlane.xlu0 %2679 }
 0xe22   :  { %4410 = vrcp.f32 %v2680_v15  ;;  %v2683_v16 = vpop.xlane.xlu1 %2682 }
 0xe23   :  { %4412 = vrcp.f32 %v2683_v16 }
 0xe25   :  { %v2686_v7 = vpop.xlane.xlu0 %2685 }
 0xe26   :  { %4414 = vrcp.f32 %v2686_v7  ;;  %v2689_v5 = vpop.xlane.xlu1 %2688 }
 0xe27   :  { %4416 = vrcp.f32 %v2689_v5 }
 0xe28   :  { %v4409_v17 = vpop.eup %4408 }
 0xe29   :  { %v2703_v20 = vmul.f32 %v4409_v17, %v2677_v14  ;;  %v2692_v21 = vpop.xlane.xlu0 %2691 }
 0xe2a   :  { %4418 = vrcp.f32 %v2692_v21 }
 0xe2b   :  { %v2711_v22 = vsub.f32 2.0, %v2703_v20 }
 0xe2c   :  { %v4411_v23 = vpop.eup %4410 }
 0xe2d   :  { %v4413_v24 = vpop.eup %4412  ;;  %v2719_v25 = vmul.f32 %v4409_v17, %v2711_v22  ;;  %v2704_v26 = vmul.f32 %v4411_v23, %v2680_v15 }
 0xe2e   :  { %v2705_v27 = vmul.f32 %v4413_v24, %v2683_v16 }
 0xe2f   :  { %v2727_v28 = vmul.f32 %v5017_v48, %v2719_v25  ;;  %v2712_v29 = vsub.f32 2.0, %v2704_v26  ;;  %v3190_v48 = vpop.permute.xlu0 %3189 }
 0xe30   :  { %v4415_v30 = vpop.eup %4414  ;;  %v2713_v31 = vsub.f32 2.0, %v2705_v27 }
 0xe31   :  { %v4417_v32 = vpop.eup %4416  ;;  %v2720_v34 = vmul.f32 %v4411_v23, %v2712_v29  ;;  %v2706_v35 = vmul.f32 %v4415_v30, %v2686_v7  ;;  %4186 = vmatmul.mubr.msk.f32.vlgmr.msra.gmra.mrb[26].mxu0 %vm184_vm2, %v2727_v28 }
 0xe32   :  { %v2721_v37 = vmul.f32 %v4413_v24, %v2713_v31  ;;  %v2707_v38 = vmul.f32 %v4417_v32, %v2689_v5  ;;  %4194 = vmatpush3.msra.mxu0 %v3038_v63  ;;  %4195 = vmatprep.mubr.msk.f32.mxu0 %vm4511_vm1, %v4508_v10  ;;  %v3855_v24 = vld [vmem:[#allocation5 + $0x9] ss:$0 sm:$0xff] }
 0xe33   :  { %v2728_v39 = vmul.f32 %v5022_v51, %v2720_v34  ;;  %v2714_v40 = vsub.f32 2.0, %v2706_v35  ;;  %4203 = vmatprep.subr.mxu0 %v4508_v10 }
 0xe34   :  { %v4419_v41 = vpop.eup %4418  ;;  %v2729_v42 = vmul.f32 %v5024_v52, %v2721_v37  ;;  %v2715_v43 = vsub.f32 2.0, %v2707_v38  ;;  %v3266_v52 = vpop.permute.xlu1 %3265 }
 0xe35   :  { %v2722_v45 = vmul.f32 %v4415_v30, %v2714_v40  ;;  %v2708_v46 = vmul.f32 %v4419_v41, %v2692_v21  ;;  %4191 = vmatmul.mubr.msk.f32.vlgmr.msra.gmra.mrb[36].mxu1 %vm184_vm2, %v2728_v39 }
 0xe36   :  { %v2723_v19 = vmul.f32 %v4417_v32, %v2715_v43  ;;  %4196 = vmatmul.mubr.msk.f32.vlgmr.msra.gmra.mrb[28].mxu0 %vm184_vm2, %v2729_v42  ;;  %4199 = vmatpush3.msra.mxu1 %v5046_v0 }
 0xe37   :  { %v2730_v18 = vmul.f32 %v5030_v55, %v2722_v45  ;;  %v2716_v49 = vsub.f32 2.0, %v2708_v46  ;;  %4204 = vmatpush3.msra.mxu0 %v3190_v48  ;;  %4200 = vmatprep.mubr.msk.f32.mxu1 %vm4511_vm1, %v4508_v10  ;;  %v3817_v45 = vld [vmem:[%s5181_s3 + $0x28] sm:$0xff]  ;;  %v3819_v48 = vld [vmem:[%s5181_s3 + $0x38] sm:$0xff] }
 0xe38   :  { %v2731_v50 = vmul.f32 %v5032_v56, %v2723_v19  ;;  %4205 = vmatprep.mubr.msk.f32.mxu0 %vm4511_vm1, %v4508_v10  ;;  %4208 = vmatprep.subr.mxu1 %v4508_v10  ;;  %v3818_v19 = vld [vmem:[%s5181_s3 + $0x30] sm:$0xff] }
 0xe39   :  { %v2724_v51 = vmul.f32 %v4419_v41, %v2716_v49  ;;  %4201 = vmatmul.mubr.msk.f32.vlgmr.msra.gmra.mrb[38].mxu1 %vm184_vm2, %v2730_v18  ;;  %4303 = vmatprep.subr.bf16.mxu0 %v4302_v61  ;;  %v4314_v18 = vpack.c.bf16 %v3819_v48, %v3818_v19  ;;  %v3820_v49 = vld [vmem:[%s5182_s4 + $0x40] sm:$0xff]  ;;  %v3866_v19 = vld [vmem:[#allocation5 + $0xe] ss:$0 sm:$0xff] }
 0xe3a   :  { %4206 = vmatmul.mubr.msk.f32.vlgmr.msra.gmra.mrb[30].mxu0 %vm184_vm2, %v2731_v50  ;;  %4209 = vmatpush3.msra.mxu1 %v3266_v52  ;;  %v3821_v50 = vld [vmem:[%s5182_s4 + $0x48] sm:$0xff] }
 0xe3b   :  { %v2732_v53 = vmul.f32 %v5038_v59, %v2724_v51  ;;  %4210 = vmatprep.mubr.msk.f32.mxu1 %vm4511_vm1, %v4508_v10  ;;  %4305 = vmatpush3.bf16.msra.mxu0 %v4302_v61  ;;  %v3814_v10 = vld [vmem:[%s5180_s2 + $0x30] sm:$0xff]  ;;  %v3815_v59 = vld [vmem:[%s5180_s2 + $0x38] sm:$0xff]  ;;  %v4318_v52 = vpack.c.bf16 %v3821_v50, %v3820_v49 }
 0xe3c   :  { %v4306_v62 = vpack.c.bf16 %v3815_v59, %v3814_v10  ;;  %v3822_v51 = vld [vmem:[%s5182_s4 + $0x50] sm:$0xff]  ;;  %v3867_v49 = vld [vmem:[#allocation5 + $0xf] ss:$0 sm:$0xff] }
 0xe3d   :  { %4211 = vmatmul.mubr.msk.f32.vlgmr.msra.gmra.mrb[40].mxu1 %vm184_vm2, %v2732_v53  ;;  %v3823_v53 = vld [vmem:[%s5182_s4 + $0x58] sm:$0xff] }
 0xe3e   :  { %4307 = vmatprep.subr.bf16.mxu0 %v4306_v62 }
 0xe3f   :  { %4309 = vmatpush3.bf16.msra.mxu0 %v4306_v62 }
 0xe40   :  { %4319 = vmatprep.subr.bf16.mxu0 %v4318_v52 }
 0xeab   :  { %v2881_v54 = vpop.f32.mrb[34].mxu1 }
 0xeac   :  { %v4182_v55 = vpop.f32.mrb[35].mxu1 }
 0xead   :  { %v3824_v55 = vld [vmem:[%s5182_s4 + $0x60] sm:$0xff] }
 0xeaf   :  { %v2805_v56 = vpop.f32.mrb[24].mxu0 }
 0xeb0   :  { %v4177_v57 = vpop.f32.mrb[25].mxu0 }
 0xf04   :  { %v2957_v63 = vpop.f32.mrb[26].mxu0 }
 0xf05   :  { %3343 = vrot.lane.b32.xlu0 %v2957_v63, %s4506_s8  ;;  %v4187_v0 = vpop.f32.mrb[27].mxu0 }
 0xf06   :  { %v3858_v0 = vld [vmem:[#allocation5 + $0xc] ss:$0 sm:$0xff] }
 0xf08   :  { %v3033_v1 = vpop.f32.mrb[36].mxu1 }
 0xf09   :  { %v3109_v2 = vpop.f32.mrb[28].mxu0  ;;  %3345 = vrot.lane.b32.xlu1 %v3033_v1, %s4506_s8  ;;  %v4192_v3 = vpop.f32.mrb[37].mxu1 }
 0xf0a   :  { %3351 = vrot.lane.b32.xlu0 %v3109_v2, %s4515_s20  ;;  %v4197_v4 = vpop.f32.mrb[29].mxu0  ;;  %v3859_v2 = vld [vmem:[#allocation5 + $0xd] ss:$0 sm:$0xff] }
 0xf0c   :  { %v3185_v6 = vpop.f32.mrb[38].mxu1 }
 0xf0d   :  { %v3261_v8 = vpop.f32.mrb[30].mxu0  ;;  %3353 = vrot.lane.b32.xlu1 %v3185_v6, %s4515_s20  ;;  %v4202_v9 = vpop.f32.mrb[39].mxu1 }
 0xf0e   :  { %3359 = vrot.lane.b32.xlu0 %v3261_v8, %s4516_s0  ;;  %v4207_v11 = vpop.f32.mrb[31].mxu0 }
 0xf10   :  { %v3337_v47 = vpop.f32.mrb[40].mxu1 }
 0xf11   :  { %3361 = vrot.lane.b32.xlu1 %v3337_v47, %s4516_s0  ;;  %v4212_v12 = vpop.f32.mrb[41].mxu1  ;;  %v3826_v47 = vld [vmem:[%s5182_s4 + $0x70] sm:$0xff] }
 0xf12   :  { %v3827_v12 = vld [vmem:[%s5182_s4 + $0x78] sm:$0xff] }
 0xf77   :  { %v3344_v13 = vpop.permute.xlu0 %3343 }
 0xf78   :  { %v3365_v15 = vsel %vm184_vm2, %v2805_v56, %v3344_v13  ;;  %v3825_v56 = vld [vmem:[%s5182_s4 + $0x68] sm:$0xff]  ;;  %v4330_v13 = vpack.c.bf16 %v3827_v12, %v3826_v47  ;;  %v3868_v47 = vld [vmem:[#allocation5 + $0x10] ss:$0 sm:$0xff]  ;;  %s4517_s4 = smov [#allocation7]  }
 0xf79   :  { %v4326_v57 = vpack.c.bf16 %v3825_v56, %v3824_v55  ;;  %s3755_s11 = sshll.u32 %s4517_s4, 4  ;;  %s3756_s11 = int_to_ptr.vmem [resolvable:$true] %s3755_s11 }
 0xf7a   :  { %s4476_s18 = scalar_lea.vmem %s3756_s11, 256  ;;  %p4481_p3 = scmp.lt.s32.totalorder %s3756_s11, %s3756_s11 }
 0xf7b   :  { %v3346_v44 = vpop.permute.xlu1 %3345  ;;  %p4477_p2 = scmp.ne.s32.totalorder %s3756_s11, %s4476_s18  ;;  %p4482_p4 = scmp.lt.s32.totalorder %s4476_s18, %s4476_s18 }
 0xf7c   :  { %v3352_v14 = vpop.permute.xlu0 %3351  ;;  %v3366_v20 = vsel %vm184_vm2, %v2881_v54, %v3346_v44  ;;  %v4322_v54 = vpack.c.bf16 %v3823_v53, %v3822_v51  ;;  %v3860_v44 = vld [vmem:[#allocation5 + $0xa] ss:$0 sm:$0xff] }
 0xf7d   :  { %v3367_v7 = vsel %vm1537_vm3, %v3365_v15, %v3352_v14  ;;  %p4483_p5 = por %p4482_p4, %p4481_p3 }
 0xf7f   :  { %v3354_v16 = vpop.permute.xlu1 %3353  ;;  %p4484_p6 = pnand %p4483_p5, %p4477_p2 }
 0xf80   :  { %v3360_v5 = vpop.permute.xlu0 %3359  ;;  %v3368_v21 = vsel %vm1537_vm3, %v3366_v20, %v3354_v16  ;;  %v3863_v20 = vld [vmem:[#allocation5 + $0xb] ss:$0 sm:$0xff] }
 0xf81   :  { %v3369_v17 = vsel %vm1540_vm4, %v3367_v7, %v3360_v5 }
 0xf82   :  { %4221 = vmatprep.mubr.msk.f32.mxu0 %vm86_vm0, %v3369_v17 }
 0xf83   :  { %v3362_v22 = vpop.permute.xlu1 %3361 }
 0xf84   :  { %v3370_v23 = vsel %vm1540_vm4, %v3368_v21, %v3362_v22 }
 0xf85   :  { %4222 = vmatmul.mubr.msk.f32.vlgmr.msra.gmra.mrb[32].mxu0 %vm86_vm0, %v3370_v23 }
 0xf86   :  { %4321 = vmatpush3.bf16.msra.mxu0 %v4318_v52 }
 0xf87   :  { %4323 = vmatprep.subr.bf16.mxu0 %v4322_v54 }
 0xf8a   :  { %4325 = vmatpush3.bf16.msra.mxu0 %v4322_v54 }
 0xf8b   :  { %4327 = vmatprep.subr.bf16.mxu0 %v4326_v57 }
 0xf8e   :  { %4329 = vmatpush3.bf16.msra.mxu0 %v4326_v57 }
 0xf8f   :  { %4331 = vmatprep.subr.bf16.mxu0 %v4330_v13 }
 0xf92   :  { %4333 = vmatpush3.bf16.msra.mxu0 %v4330_v13 }
0x1058   :  { %v4223_v25 = vpop.f32.mrb[32].mxu0 }
0x1059   :  { %v3453_v26 = vadd.f32 %v4223_v25, %v3855_v24  ;;  %v3447_v27 = vpop.f32.mrb[33].mxu0 }
0x105a   :  { %v3448_v28 = vadd.f32 %v3855_v24, %v3447_v27 }
0x105b   :  { %v3457_v29 = vadd.f32 %v3453_v26, %v4888_v36 }
0x105c   :  { %v3456_v30 = vadd.f32 %v3448_v28, %v4886_v33  ;;  %v3816_v33 = vld [vmem:[%s5181_s3 + $0x20] sm:$0xff] }
0x105d   :  { %v3461_v31 = vsel %vm86_vm0, %v3457_v29, 0.0  ;;  %v4310_v46 = vpack.c.bf16 %v3817_v45, %v3816_v33 }
0x105e   :  { %3462 = vadd.xlane.f32.xlu1 %v3461_v31  ;;  %v3458_v32 = vsel %vm86_vm0, %v3456_v30, 0.0 }
0x105f   :  { %3459 = vadd.xlane.f32.xlu0 %v3458_v32  ;;  %4311 = vmatprep.subr.bf16.mxu1 %v4310_v46 }
0x1060   :  { %4313 = vmatpush3.bf16.msra.mxu1 %v4310_v46 }
0x1061   :  { %4315 = vmatprep.subr.bf16.mxu1 %v4314_v18 }
0x1064   :  { %4317 = vmatpush3.bf16.msra.mxu1 %v4314_v18 }
0x10eb   :  { %v3463_v34 = vpop.xlane.xlu1 %3462 }
0x10ec   :  { %v3465_v35 = vmul.f32 0.03125, %v3463_v34  ;;  %v3460_v37 = vpop.xlane.xlu0 %3459 }
0x10ed   :  { %v3464_v38 = vmul.f32 0.03125, %v3460_v37 }
0x10ee   :  { %v3467_v39 = vsub.f32 %v3457_v29, %v3465_v35 }
0x10ef   :  { %v3466_v40 = vsub.f32 %v3456_v30, %v3464_v38 }
0x10f0   :  { %v3469_v43 = vmul.f32 %v3467_v39, %v3467_v39 }
0x10f1   :  { %v3468_v41 = vmul.f32 %v3466_v40, %v3466_v40 }
0x10f2   :  { %v3473_v36 = vsel %vm86_vm0, %v3469_v43, 0.0 }
0x10f3   :  { %v3470_v42 = vsel %vm86_vm0, %v3468_v41, 0.0 }
0x10f4   :  { %3471 = vadd.xlane.f32.xlu0 %v3470_v42 }
0x10f8   :  { %3474 = vadd.xlane.f32.xlu0 %v3473_v36 }
0x1181   :  { %v3472_v58 = vpop.xlane.xlu0 %3471 }
0x1182   :  { %v3476_v60 = vmul.f32 0.03125, %v3472_v58 }
0x1184   :  { %v3478_v61 = vadd.f32 1e-05, %v3476_v60 }
0x1185   :  { %v3475_v10 = vpop.xlane.xlu0 %3474 }
0x1186   :  { %4420 = vrsqrt.f32 %v3478_v61  ;;  %v3477_v59 = vmul.f32 0.03125, %v3475_v10 }
0x1188   :  { %v3479_v62 = vadd.f32 1e-05, %v3477_v59 }
0x118a   :  { %4422 = vrsqrt.f32 %v3479_v62 }
0x1190   :  { %v4421_v63 = vpop.eup %4420 }
0x1191   :  { %v3482_v1 = vmul.f32 %v4421_v63, %v3466_v40 }
0x1193   :  { %v3488_v3 = vmul.f32 %v3858_v0, %v3482_v1 }
0x1194   :  { %v4423_v4 = vpop.eup %4422 }
0x1195   :  { %v3483_v6 = vmul.f32 %v4423_v4, %v3467_v39  ;;  %v3494_v8 = vadd.f32 %v3859_v2, %v3488_v3 }
0x1197   :  { %v3489_v9 = vmul.f32 %v3858_v0, %v3483_v6  ;;  %4232 = vmatprep.mubr.msk.f32.mxu1 %vm86_vm0, %v3494_v8 }
0x1199   :  { %v3495_v11 = vadd.f32 %v3859_v2, %v3489_v9 }
0x119b   :  { %4233 = vmatmul.mubr.msk.f32.vlgmr.msra.gmra.mrb[42].mxu1 %vm86_vm0, %v3495_v11 }
0x126e   :  { %v4234_v14 = vpop.f32.mrb[42].mxu1 }
0x126f   :  { %v3578_v15 = vadd.f32 %v4234_v14, %v3860_v44  ;;  %v3572_v16 = vpop.f32.mrb[43].mxu1  ;;  %v3869_v14 = vld [vmem:[#allocation5 + $0x11] ss:$0 sm:$0xff] }
0x1270   :  { %v3573_v7 = vadd.f32 %v3860_v44, %v3572_v16 }
0x1271   :  { %v3582_v17 = vmax.f32 %v3578_v15, 0.0 }
0x1272   :  { %v3581_v5 = vmax.f32 %v3573_v7, 0.0 }
0x1274   :  { %4251 = vmatprep.mubr.msk.f32.mxu0 %vm1760_vm5, %v3581_v5 }
0x1275   :  { %4252 = vmatmul.mubr.msk.f32.vlgmr.msra.gmra.mrb[34].mxu0 %vm1760_vm5, %v3582_v17 }
0x1348   :  { %v4253_v21 = vpop.f32.mrb[34].mxu0 }
0x1349   :  { %v3665_v22 = vadd.f32 %v4253_v21, %v3863_v20  ;;  %v3659_v23 = vpop.f32.mrb[35].mxu0 }
0x134a   :  { %v3660_v24 = vadd.f32 %v3863_v20, %v3659_v23 }
0x134b   :  { %v3669_v25 = vadd.f32 %v3665_v22, %v3495_v11 }
0x134c   :  { %v3668_v26 = vadd.f32 %v3660_v24, %v3494_v8 }
0x134d   :  { %v3673_v27 = vsel %vm86_vm0, %v3669_v25, 0.0 }
0x134e   :  { %3674 = vadd.xlane.f32.xlu0 %v3673_v27  ;;  %v3670_v28 = vsel %vm86_vm0, %v3668_v26, 0.0 }
0x134f   :  { %3671 = vadd.xlane.f32.xlu1 %v3670_v28 }
0x13db   :  { %v3675_v29 = vpop.xlane.xlu0 %3674 }
0x13dc   :  { %v3677_v30 = vmul.f32 0.03125, %v3675_v29  ;;  %v3672_v31 = vpop.xlane.xlu1 %3671 }
0x13dd   :  { %v3676_v32 = vmul.f32 0.03125, %v3672_v31 }
0x13de   :  { %v3679_v34 = vsub.f32 %v3669_v25, %v3677_v30 }
0x13df   :  { %v3678_v35 = vsub.f32 %v3668_v26, %v3676_v32 }
0x13e0   :  { %v3681_v37 = vmul.f32 %v3679_v34, %v3679_v34 }
0x13e1   :  { %v3680_v38 = vmul.f32 %v3678_v35, %v3678_v35 }
0x13e2   :  { %v3685_v39 = vsel %vm86_vm0, %v3681_v37, 0.0 }
0x13e3   :  { %3686 = vadd.xlane.f32.xlu0 %v3685_v39  ;;  %v3682_v40 = vsel %vm86_vm0, %v3680_v38, 0.0 }
0x13e4   :  { %3683 = vadd.xlane.f32.xlu1 %v3682_v40 }
0x1470   :  { %v3687_v41 = vpop.xlane.xlu0 %3686 }
0x1471   :  { %v3689_v42 = vmul.f32 0.03125, %v3687_v41  ;;  %v3684_v43 = vpop.xlane.xlu1 %3683 }
0x1472   :  { %v3688_v36 = vmul.f32 0.03125, %v3684_v43 }
0x1473   :  { %v3691_v33 = vadd.f32 1e-05, %v3689_v42 }
0x1474   :  { %v3690_v45 = vadd.f32 1e-05, %v3688_v36 }
0x1475   :  { %4424 = vrsqrt.f32 %v3691_v33 }
0x1476   :  { %4426 = vrsqrt.f32 %v3690_v45 }
0x147f   :  { %v4425_v46 = vpop.eup %4424 }
0x1480   :  { %v4427_v48 = vpop.eup %4426  ;;  %v3695_v18 = vmul.f32 %v4425_v46, %v3679_v34 }
0x1481   :  { %v3694_v50 = vmul.f32 %v4427_v48, %v3678_v35 }
0x1482   :  { %v3701_v51 = vmul.f32 %v3866_v19, %v3695_v18 }
0x1483   :  { %v3700_v52 = vmul.f32 %v3866_v19, %v3694_v50 }
0x1484   :  { %v3707_v53 = vadd.f32 %v3867_v49, %v3701_v51 }
0x1485   :  { %v3706_v54 = vadd.f32 %v3867_v49, %v3700_v52 }
0x1486   :  { %v3713_v55 = vsel %vm86_vm0, %v3707_v53, 0.0 }
0x1487   :  { %3714 = vadd.xlane.f32.xlu0 %v3713_v55  ;;  %v3710_v56 = vsel %vm86_vm0, %v3706_v54, 0.0 }
0x1488   :  { %3711 = vadd.xlane.f32.xlu1 %v3710_v56 }
0x1514   :  { %v3715_v57 = vpop.xlane.xlu0 %3714 }
0x1515   :  { %v3717_v58 = vmul.f32 0.03125, %v3715_v57  ;;  %v3712_v60 = vpop.xlane.xlu1 %3711 }
0x1516   :  { %v3716_v61 = vmul.f32 0.03125, %v3712_v60 }
0x1517   :  { %v3719_v10 = vsub.f32 %v3707_v53, %v3717_v58 }
0x1518   :  { %v3718_v59 = vsub.f32 %v3706_v54, %v3716_v61 }
0x1519   :  { %v3721_v62 = vmul.f32 %v3719_v10, %v3719_v10 }
0x151a   :  { %v3720_v63 = vmul.f32 %v3718_v59, %v3718_v59 }
0x151b   :  { %v3725_v0 = vsel %vm86_vm0, %v3721_v62, 0.0 }
0x151c   :  { %3726 = vadd.xlane.f32.xlu0 %v3725_v0  ;;  %v3722_v1 = vsel %vm86_vm0, %v3720_v63, 0.0 }
0x151d   :  { %3723 = vadd.xlane.f32.xlu1 %v3722_v1 }
0x15a9   :  { %v3727_v2 = vpop.xlane.xlu0 %3726 }
0x15aa   :  { %v3729_v3 = vmul.f32 0.03125, %v3727_v2  ;;  %v3724_v4 = vpop.xlane.xlu1 %3723 }
0x15ab   :  { %v3728_v6 = vmul.f32 0.03125, %v3724_v4 }
0x15ac   :  { %v3731_v8 = vadd.f32 1e-05, %v3729_v3 }
0x15ad   :  { %v3730_v9 = vadd.f32 1e-05, %v3728_v6 }
0x15ae   :  { %4428 = vrsqrt.f32 %v3731_v8 }
0x15af   :  { %4430 = vrsqrt.f32 %v3730_v9 }
0x15b8   :  { %v4429_v11 = vpop.eup %4428 }
0x15b9   :  { %v4431_v12 = vpop.eup %4430  ;;  %v3735_v13 = vmul.f32 %v4429_v11, %v3719_v10 }
0x15ba   :  { %v3734_v44 = vmul.f32 %v4431_v12, %v3718_v59 }
0x15bb   :  { %v3741_v15 = vmul.f32 %v3868_v47, %v3735_v13 }
0x15bc   :  { %v3740_v16 = vmul.f32 %v3868_v47, %v3734_v44 }
0x15bd   :  { %v3747_v7 = vadd.f32 %v3869_v14, %v3741_v15 }
0x15be   :  { %v3746_v5 = vadd.f32 %v3869_v14, %v3740_v16 }
0x15bf   :  { %3749 = vst.msk [vmem:[#allocation7 + $0x8] sm:$0xff] %vm86_vm0, %v3747_v7 }
0x15c0   :  { %3748 = vst.msk [vmem:[#allocation7] sm:$0xff] %vm86_vm0, %v3746_v5 }
0x15c1   :  { %4487 = shalt.err (!%p4484_p6)
}
0x15c2   :  { %s4488_s20 = scalar_lea.hbm %s5184_s6, 256 }
0x15c3   :  { %p4489_p7 = scmp.ne.s32.totalorder %s5184_s6, %s4488_s20  ;;  %p4492_p8 = scmp.lt.u32.totalorder %s4488_s20, %s5184_s6 }
0x15c5   :  { %p4494_p9 = pnand %p4492_p8, %p4489_p7 }
0x15c7   :  { %4497 = shalt.err (!%p4494_p9)
}
0x15c8   :  { %3761 = dma.vmem_to_hbm [thread:$0]  %s3756_s11, 256, %s5184_s6, [#allocation4], %s4505_s7, %s4505_s7, %s4506_s8  }
0x15c9   :  { %4502 = dma.done.wait [#allocation4], 256  }
0x15ca   :  { %4503 = vsyncadd [#allocation4], 4294967040 }
0x15cb   :  { %3765 = vsyncpa [#allocation3], 1 }
0x15cc   :  { %3766 = vsyncpa [#allocation6], 1 }
0x15cd   :  { %3767 = vsyncpa [#allocation4], 1 }

</bundles_post_ra>
